<compile_context>
chip_gen: v6e
topology: v6e:2x2x1
jax: 0.10.0
libtpu: 0.0.40
codegen_flags: <defaults>
</compile_context>

<pallas_src>
import jax
import jax.numpy as jnp
from jax import lax
from jax.experimental import pallas as pl
from jax.experimental.pallas import tpu as pltpu


def _gate_mask(bp, g, h):
    """Lane mask selecting the cell-candidate ('g', tanh) quarter of a 4H gate slab."""
    lane = lax.broadcasted_iota(jnp.int32, (bp, g), 1)
    return (lane >= 2 * h) & (lane < 3 * h)


def _lstm_cell(act, c, h):
    """One LSTM cell update from an activated (BP, 4H) gate slab (cols i|f|g|o)."""
    i = act[:, 0:h]
    f = act[:, h:2 * h]
    g = act[:, 2 * h:3 * h]
    o = act[:, 3 * h:4 * h]
    c_new = f * c + i * g
    h_new = o * jnp.tanh(c_new)
    return h_new, c_new


def _make_wavefront2_kernel(T, BP, H, O_pad):
    """2-layer LSTM with both layers wavefront-fused into one 256-lane gate matmul."""
    G = 4 * H

    def kernel(x_ref, h0_ref, c0_ref, wih1_ref, wbig_ref, bias_ref,
               wlin_ref, blin_ref, y_ref, hn_ref, cn_ref, seq_ref, gx1_ref):
        # x_ref   : (T*BP, Din)   time-major layer-1 input (row = t*BP + b)
        # wih1_ref: (Din, G)      layer-1 input projection (gate cols i|f|g|o)
        # wbig_ref: (2H, 2G)      [[Whh1 | Wih2], [0 | Whh2]]
        # bias_ref: (2, 1, G)     fused b_ih + b_hh per layer
        # seq_ref : (T*BP, H)     last-layer outputs (scratch)
        # gx1_ref : (T*BP, G)     hoisted layer-1 input projection (scratch)
        gmask = _gate_mask(BP, G, H)
        wbig = wbig_ref[...]
        b2 = bias_ref[1]

        # Hoisted, time-independent layer-1 input projection (+ fused bias):
        # one big matmul feeding the MXU with all T*BP rows at once.
        gx1_ref[...] = (jnp.dot(x_ref[...], wih1_ref[...],
                                preferred_element_type=jnp.float32) + bias_ref[0])

        def activate(gates):
            # 2 full-slab EUP calls + one lane-mask select instead of 4 tiny ones.
            return jnp.where(gmask, jnp.tanh(gates), jax.nn.sigmoid(gates))

        h1, c1 = h0_ref[0], c0_ref[0]
        h2, c2 = h0_ref[1], c0_ref[1]

        # Wavefront step s = 0: only layer 1 (t = 0) is valid.
        g1 = (jnp.dot(h1, wbig[0:H, 0:G], preferred_element_type=jnp.float32)
              + gx1_ref[pl.ds(0, BP), :])
        h1, c1 = _lstm_cell(activate(g1), c1, H)

        # Wavefront steps s = 1 .. T-1: layer 1 at t=s and layer 2 at t=s-1 fused
        # into ONE (BP, 2H) x (2H, 2G) matmul (256 output lanes).
        # TODO(synk): on v7x the gx1/b2 addends could stay on the MXU result path
        # (MRB in-place accumulate); kept as a portable full-tile VALU add here.
        def wstep(s, carry):
            h1, c1, h2, c2 = carry
            lhs = jnp.concatenate([h1, h2], axis=-1)                       # (BP, 2H)
            gb = jnp.dot(lhs, wbig, preferred_element_type=jnp.float32)    # (BP, 2G)
            row = pl.multiple_of(s * BP, BP)
            g1 = gb[:, 0:G] + gx1_ref[pl.ds(row, BP), :]
            g2 = gb[:, G:2 * G] + b2
            h1n, c1n = _lstm_cell(activate(g1), c1, H)
            h2n, c2n = _lstm_cell(activate(g2), c2, H)
            prev = pl.multiple_of((s - 1) * BP, BP)
            seq_ref[pl.ds(prev, BP), :] = h2n                              # t = s-1
            return h1n, c1n, h2n, c2n

        h1, c1, h2, c2 = lax.fori_loop(1, T, wstep, (h1, c1, h2, c2), unroll=True)

        # Wavefront step s = T: only layer 2 (t = T-1) is valid.
        lhs = jnp.concatenate([h1, h2], axis=-1)
        g2 = (jnp.dot(lhs, wbig[:, G:2 * G], preferred_element_type=jnp.float32) + b2)
        h2, c2 = _lstm_cell(activate(g2), c2, H)
        seq_ref[pl.ds(pl.multiple_of((T - 1) * BP, BP), BP), :] = h2

        hn_ref[0] = h1
        cn_ref[0] = c1
        hn_ref[1] = h2
        cn_ref[1] = c2
        # TODO(synk): PyTorch applies dropout(p=0.3) between LSTM layers only in
        # training mode; this kernel reproduces eval/inference semantics.

        # Lane-dense linear head: ONE matmul over the whole flattened sequence.
        y_ref[...] = (jnp.dot(seq_ref[...], wlin_ref[...],
                              preferred_element_type=jnp.float32) + blin_ref[...])

    return kernel


def _make_sequential_kernel(L, T, BP, H, O_pad):
    """General num_layers fallback: layer-sequential, fully-unrolled recurrence."""
    G = 4 * H

    def kernel(*refs):
        x_ref, h0_ref, c0_ref, wih0_ref = refs[0:4]
        pos = 4
        if L > 1:
            wrest_ref = refs[4]            # (L-1, H, G)
            pos = 5
        whh_ref, bias_ref, wlin_ref, blin_ref = refs[pos:pos + 4]
        y_ref, hn_ref, cn_ref = refs[pos + 4:pos + 7]
        seq_ref, gx_ref = refs[pos + 7:pos + 9]

        gmask = _gate_mask(BP, G, H)

        for l in range(L):
            whh = whh_ref[l]               # (H, G)
            b = bias_ref[l]                # (1, G)
            # Hoisted time-independent input projection + fused bias.
            if l == 0:
                proj = jnp.dot(x_ref[...], wih0_ref[...],
                               preferred_element_type=jnp.float32)
            else:
                proj = jnp.dot(seq_ref[...], wrest_ref[l - 1],
                               preferred_element_type=jnp.float32)
            gx_ref[...] = proj + b

            def step(t, carry, whh=whh):
                h, c = carry
                row = pl.multiple_of(t * BP, BP)
                gates = (jnp.dot(h, whh, preferred_element_type=jnp.float32)
                         + gx_ref[pl.ds(row, BP), :])
                act = jnp.where(gmask, jnp.tanh(gates), jax.nn.sigmoid(gates))
                h_new, c_new = _lstm_cell(act, c, H)
                seq_ref[pl.ds(row, BP), :] = h_new
                return h_new, c_new

            h_fin, c_fin = lax.fori_loop(0, T, step, (h0_ref[l], c0_ref[l]),
                                         unroll=True)
            hn_ref[l] = h_fin
            cn_ref[l] = c_fin

        y_ref[...] = (jnp.dot(seq_ref[...], wlin_ref[...],
                              preferred_element_type=jnp.float32) + blin_ref[...])

    return kernel


def simple_lstm_forward(x, h0, c0, params):
    """x: (B, T, input_dim); h0/c0: (num_layers, B, H). Returns (y, h_n, c_n)."""
    B, T, D = x.shape
    L, _, H = h0.shape
    G = 4 * H
    O = params["w_lin"].shape[0]
    O_pad = max(128, ((O + 127) // 128) * 128)     # lane-dense output slab
    BP = max(8, ((B + 7) // 8) * 8)                # sublane-padded batch
    f32 = jnp.float32

    # Time-major, sublane-padded, flattened to (T*BP, D); row index = t*BP + b.
    x_tm = jnp.transpose(x, (1, 0, 2)).astype(f32)
    x_p = jnp.zeros((T, BP, D), f32).at[:, :B, :].set(x_tm).reshape(T * BP, D)
    h0_p = jnp.zeros((L, BP, H), f32).at[:, :B, :].set(h0.astype(f32))
    c0_p = jnp.zeros((L, BP, H), f32).at[:, :B, :].set(c0.astype(f32))

    # PyTorch weight_{ih,hh}_l{k}: (4H, d_in), rows ordered [i,f,g,o]; transpose so
    # gate columns are concatenated i|f|g|o along lanes (4H = 128 at H = 32).
    wih_t = [jnp.transpose(params["w_ih"][l]).astype(f32) for l in range(L)]
    whh_t = [jnp.transpose(params["w_hh"][l]).astype(f32) for l in range(L)]
    bsum = jnp.stack([(params["b_ih"][l] + params["b_hh"][l]).reshape(1, G).astype(f32)
                      for l in range(L)])                                   # (L, 1, G)
    wlin = jnp.zeros((H, O_pad), f32).at[:, :O].set(
        jnp.transpose(params["w_lin"]).astype(f32))
    blin = jnp.zeros((1, O_pad), f32).at[:, :O].set(
        params["b_lin"].reshape(1, O).astype(f32))

    if L == 2:
        # Block weight for the wavefront-fused gate matmul:
        #   [h1 | h2] @ [[Whh1 | Wih2], [0 | Whh2]] -> [gates_layer1 | gates_layer2]
        wbig = jnp.concatenate([
            jnp.concatenate([whh_t[0], wih_t[1]], axis=1),
            jnp.concatenate([jnp.zeros((H, G), f32), whh_t[1]], axis=1)], axis=0)
        inputs = (x_p, h0_p, c0_p, wih_t[0], wbig, bsum, wlin, blin)
        kernel = _make_wavefront2_kernel(T, BP, H, O_pad)
    else:
        inputs = [x_p, h0_p, c0_p, wih_t[0]]
        if L > 1:
            inputs.append(jnp.stack(wih_t[1:]))
        inputs += [jnp.stack(whh_t), bsum, wlin, blin]
        inputs = tuple(inputs)
        kernel = _make_sequential_kernel(L, T, BP, H, O_pad)

    # No grid and no dual-TC split: latency-bound at these sizes; the resident VMEM
    # footprint is a few tens of KiB (far below even v7x's 64 MiB).  Revisit (tile T
    # with a grid + persistent h/c scratch) only when T*BP reaches ~50-100K rows.
    vmem = pl.BlockSpec(memory_space=pltpu.MemorySpace.VMEM)
    y_flat, hn_p, cn_p = pl.pallas_call(
        kernel,
        out_shape=(
            jax.ShapeDtypeStruct((T * BP, O_pad), f32),
            jax.ShapeDtypeStruct((L, BP, H), f32),
            jax.ShapeDtypeStruct((L, BP, H), f32),
        ),
        in_specs=[vmem] * len(inputs),
        out_specs=(vmem, vmem, vmem),
        scratch_shapes=[
            pltpu.VMEM((T * BP, H), f32),      # last-layer output sequence
            pltpu.VMEM((T * BP, G), f32),      # hoisted input projection
        ],
    )(*inputs)

    y = y_flat.reshape(T, BP, O_pad)[:, :B, :O]
    return jnp.transpose(y, (1, 0, 2)), hn_p[:, :B, :], cn_p[:, :B, :]


def init_params(key, input_dim, hidden_dim, out_dim, num_layers):
    """Deterministic PyTorch-style uniform(-1/sqrt(H), 1/sqrt(H)) init."""
    k = hidden_dim ** -0.5
    params = {"w_ih": [], "w_hh": [], "b_ih": [], "b_hh": []}
    for l in range(num_layers):
        d_in = input_dim if l == 0 else hidden_dim
        key, k1, k2, k3, k4 = jax.random.split(key, 5)
        params["w_ih"].append(jax.random.uniform(k1, (4 * hidden_dim, d_in), jnp.float32, -k, k))
        params["w_hh"].append(jax.random.uniform(k2, (4 * hidden_dim, hidden_dim), jnp.float32, -k, k))
        params["b_ih"].append(jax.random.uniform(k3, (4 * hidden_dim,), jnp.float32, -k, k))
        params["b_hh"].append(jax.random.uniform(k4, (4 * hidden_dim,), jnp.float32, -k, k))
    key, k1, k2 = jax.random.split(key, 3)
    params["w_lin"] = jax.random.uniform(k1, (out_dim, hidden_dim), jnp.float32, -k, k)
    params["b_lin"] = jax.random.uniform(k2, (out_dim,), jnp.float32, -k, k)
    return params


def ref_forward(x, h0, c0, params):
    """Pure-JAX reference identical to torch LSTM(batch_first) + Linear (eval mode)."""
    L = len(params["w_ih"])
    H = h0.shape[-1]
    seq = x
    hs, cs = [], []
    for l in range(L):
        wih, whh = params["w_ih"][l], params["w_hh"][l]
        b = params["b_ih"][l] + params["b_hh"][l]
        h, c = h0[l], c0[l]
        outs = []
        for t in range(seq.shape[1]):
            gates = seq[:, t, :] @ wih.T + h @ whh.T + b
            i = jax.nn.sigmoid(gates[:, :H])
            f = jax.nn.sigmoid(gates[:, H:2 * H])
            g = jnp.tanh(gates[:, 2 * H:3 * H])
            o = jax.nn.sigmoid(gates[:, 3 * H:])
            c = f * c + i * g
            h = o * jnp.tanh(c)
            outs.append(h)
        seq = jnp.stack(outs, axis=1)
        hs.append(h)
        cs.append(c)
    y = seq @ params["w_lin"].T + params["b_lin"]
    return y, jnp.stack(hs), jnp.stack(cs)


if __name__ == "__main__":
    B, T = 2, 8
    input_dim, hidden_dim, out_dim, num_layers = 16, 32, 4, 2

    key = jax.random.PRNGKey(0)
    kp, kx, kh, kc = jax.random.split(key, 4)
    params = init_params(kp, input_dim, hidden_dim, out_dim, num_layers)
    x = jax.random.normal(kx, (B, T, input_dim), jnp.float32)
    # init_hidden: h ~ U[0,1), c ~ N(0,1)
    h0 = jax.random.uniform(kh, (num_layers, B, hidden_dim), jnp.float32)
    c0 = jax.random.normal(kc, (num_layers, B, hidden_dim), jnp.float32)

    y, hn, cn = simple_lstm_forward(x, h0, c0, params)
    jax.block_until_ready((y, hn, cn))

    y_r, hn_r, cn_r = ref_forward(x, h0, c0, params)
    assert y.shape == (B, T, out_dim)
    assert jnp.allclose(y, y_r, atol=2e-3, rtol=2e-3)
    assert jnp.allclose(hn, hn_r, atol=2e-3, rtol=2e-3)
    assert jnp.allclose(cn, cn_r, atol=2e-3, rtol=2e-3)
    print("KERNEL_OK")
</pallas_src>

<mosaic_0001>
module attributes {stable_mosaic.version = 11 : i64} {
  func.func @kernel(%arg0: memref<64x16xf32, #tpu.memory_space<vmem>>, %arg1: memref<2x8x32xf32, #tpu.memory_space<vmem>>, %arg2: memref<2x8x32xf32, #tpu.memory_space<vmem>>, %arg3: memref<16x128xf32, #tpu.memory_space<vmem>>, %arg4: memref<64x256xf32, #tpu.memory_space<vmem>>, %arg5: memref<2x1x128xf32, #tpu.memory_space<vmem>>, %arg6: memref<32x128xf32, #tpu.memory_space<vmem>>, %arg7: memref<1x128xf32, #tpu.memory_space<vmem>>, %arg8: memref<64x128xf32, #tpu.memory_space<vmem>>, %arg9: memref<2x8x32xf32, #tpu.memory_space<vmem>>, %arg10: memref<2x8x32xf32, #tpu.memory_space<vmem>>, %arg11: memref<64x32xf32, #tpu.memory_space<vmem>>, %arg12: memref<64x128xf32, #tpu.memory_space<vmem>>) attributes {dimension_semantics = [], scalar_prefetch = 0 : i64, scratch_operands = 2 : i64, tpu.core_type = #tpu.core_type<tc>} {
    %0 = tpu.iota {dimensions = array<i32: 1>} : vector<8x128xi32>
    %c64_i32 = arith.constant 64 : i32
    %1 = vector.broadcast %c64_i32 : i32 to vector<8x128xi32>
    %2 = arith.cmpi sge, %0, %1 : vector<8x128xi32>
    %c96_i32 = arith.constant 96 : i32
    %3 = vector.broadcast %c96_i32 : i32 to vector<8x128xi32>
    %4 = arith.cmpi slt, %0, %3 : vector<8x128xi32>
    %5 = arith.andi %2, %4 : vector<8x128xi1>
    %c0 = arith.constant 0 : index
    %c0_0 = arith.constant 0 : index
    %6 = vector.load %arg4[%c0, %c0_0] : memref<64x256xf32, #tpu.memory_space<vmem>>, vector<64x256xf32>
    %c1 = arith.constant 1 : index
    %c0_1 = arith.constant 0 : index
    %c0_2 = arith.constant 0 : index
    %7 = vector.load %arg5[%c1, %c0_1, %c0_2] : memref<2x1x128xf32, #tpu.memory_space<vmem>>, vector<1x1x128xf32>
    %8 = vector.shape_cast %7 : vector<1x1x128xf32> to vector<1x128xf32>
    %c0_3 = arith.constant 0 : index
    %c0_4 = arith.constant 0 : index
    %9 = vector.load %arg0[%c0_3, %c0_4] : memref<64x16xf32, #tpu.memory_space<vmem>>, vector<64x16xf32>
    %c0_5 = arith.constant 0 : index
    %c0_6 = arith.constant 0 : index
    %10 = vector.load %arg3[%c0_5, %c0_6] : memref<16x128xf32, #tpu.memory_space<vmem>>, vector<16x128xf32>
    %cst = arith.constant dense<0.000000e+00> : vector<64x128xf32>
    %11 = tpu.matmul %9, %10, %cst {dimension_numbers = #tpu.dot_dimension_numbers<[1], [0], [0], [1], [0, 0, 1, 1], [], []>} : vector<64x16xf32>, vector<16x128xf32>, vector<64x128xf32> -> vector<64x128xf32>
    %c0_7 = arith.constant 0 : index
    %c0_8 = arith.constant 0 : index
    %c0_9 = arith.constant 0 : index
    %12 = vector.load %arg5[%c0_7, %c0_8, %c0_9] : memref<2x1x128xf32, #tpu.memory_space<vmem>>, vector<1x1x128xf32>
    %13 = vector.shape_cast %12 : vector<1x1x128xf32> to vector<1x128xf32>
    %14 = vector.broadcast %13 : vector<1x128xf32> to vector<64x128xf32>
    %15 = arith.addf %11, %14 : vector<64x128xf32>
    %c0_10 = arith.constant 0 : index
    %c0_11 = arith.constant 0 : index
    %16 = vector.load %arg12[%c0_10, %c0_11] : memref<64x128xf32, #tpu.memory_space<vmem>>, vector<64x128xf32>
    tpu.vector_store %arg12[%c0_10, %c0_11], %15 {strides = array<i32>} : memref<64x128xf32, #tpu.memory_space<vmem>>, vector<64x128xf32>,
    %c0_12 = arith.constant 0 : index
    %c0_13 = arith.constant 0 : index
    %c0_14 = arith.constant 0 : index
    %17 = vector.load %arg1[%c0_12, %c0_13, %c0_14] : memref<2x8x32xf32, #tpu.memory_space<vmem>>, vector<1x8x32xf32>
    %18 = vector.shape_cast %17 : vector<1x8x32xf32> to vector<8x32xf32>
    %c0_15 = arith.constant 0 : index
    %c0_16 = arith.constant 0 : index
    %c0_17 = arith.constant 0 : index
    %19 = vector.load %arg2[%c0_15, %c0_16, %c0_17] : memref<2x8x32xf32, #tpu.memory_space<vmem>>, vector<1x8x32xf32>
    %20 = vector.shape_cast %19 : vector<1x8x32xf32> to vector<8x32xf32>
    %c1_18 = arith.constant 1 : index
    %c0_19 = arith.constant 0 : index
    %c0_20 = arith.constant 0 : index
    %21 = vector.load %arg1[%c1_18, %c0_19, %c0_20] : memref<2x8x32xf32, #tpu.memory_space<vmem>>, vector<1x8x32xf32>
    %22 = vector.shape_cast %21 : vector<1x8x32xf32> to vector<8x32xf32>
    %c1_21 = arith.constant 1 : index
    %c0_22 = arith.constant 0 : index
    %c0_23 = arith.constant 0 : index
    %23 = vector.load %arg2[%c1_21, %c0_22, %c0_23] : memref<2x8x32xf32, #tpu.memory_space<vmem>>, vector<1x8x32xf32>
    %24 = vector.shape_cast %23 : vector<1x8x32xf32> to vector<8x32xf32>
    %25 = vector.extract_strided_slice %6 {offsets = [0, 0], sizes = [32, 128], strides = [1, 1]} : vector<64x256xf32> to vector<32x128xf32>
    %cst_24 = arith.constant dense<0.000000e+00> : vector<8x128xf32>
    %26 = tpu.matmul %18, %25, %cst_24 {dimension_numbers = #tpu.dot_dimension_numbers<[1], [0], [0], [1], [0, 0, 1, 1], [], []>} : vector<8x32xf32>, vector<32x128xf32>, vector<8x128xf32> -> vector<8x128xf32>
    %c0_25 = arith.constant 0 : index
    %c0_26 = arith.constant 0 : index
    %27 = vector.load %arg12[%c0_25, %c0_26] : memref<64x128xf32, #tpu.memory_space<vmem>>, vector<8x128xf32>
    %28 = arith.addf %26, %27 : vector<8x128xf32>
    %29 = math.tanh %28 : vector<8x128xf32>
    %30 = arith.negf %28 : vector<8x128xf32>
    %31 = math.exp %30 : vector<8x128xf32>
    %cst_27 = arith.constant 1.000000e+00 : f32
    %32 = vector.broadcast %cst_27 : f32 to vector<8x128xf32>
    %33 = arith.addf %32, %31 : vector<8x128xf32>
    %34 = arith.divf %32, %33 : vector<8x128xf32>
    %35 = arith.select %5, %29, %34 : vector<8x128xi1>, vector<8x128xf32>
    %36 = vector.extract_strided_slice %35 {offsets = [0, 0], sizes = [8, 32], strides = [1, 1]} : vector<8x128xf32> to vector<8x32xf32>
    %37 = vector.extract_strided_slice %35 {offsets = [0, 32], sizes = [8, 32], strides = [1, 1]} : vector<8x128xf32> to vector<8x32xf32>
    %38 = vector.extract_strided_slice %35 {offsets = [0, 64], sizes = [8, 32], strides = [1, 1]} : vector<8x128xf32> to vector<8x32xf32>
    %39 = vector.extract_strided_slice %35 {offsets = [0, 96], sizes = [8, 32], strides = [1, 1]} : vector<8x128xf32> to vector<8x32xf32>
    %40 = arith.mulf %37, %20 : vector<8x32xf32>
    %41 = arith.mulf %36, %38 : vector<8x32xf32>
    %42 = arith.addf %40, %41 : vector<8x32xf32>
    %43 = math.tanh %42 : vector<8x32xf32>
    %44 = arith.mulf %39, %43 : vector<8x32xf32>
    %c1_i32 = arith.constant 1 : i32
    %45 = tpu.concatenate %44, %22 in 1 : vector<8x32xf32>, vector<8x32xf32> -> vector<8x64xf32>
    %cst_28 = arith.constant dense<0.000000e+00> : vector<8x256xf32>
    %46 = tpu.matmul %45, %6, %cst_28 {dimension_numbers = #tpu.dot_dimension_numbers<[1], [0], [0], [1], [0, 0, 1, 1], [], []>} : vector<8x64xf32>, vector<64x256xf32>, vector<8x256xf32> -> vector<8x256xf32>
    %c8_i32 = arith.constant 8 : i32
    %47 = arith.muli %c1_i32, %c8_i32 : i32
    %48 = tpu.assume_multiple %47, 8 : i32
    %49 = vector.extract_strided_slice %46 {offsets = [0, 0], sizes = [8, 128], strides = [1, 1]} : vector<8x256xf32> to vector<8x128xf32>
    %50 = arith.index_cast %48 : i32 to index
    %c0_29 = arith.constant 0 : index
    %51 = vector.load %arg12[%50, %c0_29] : memref<64x128xf32, #tpu.memory_space<vmem>>, vector<8x128xf32>
    %52 = arith.addf %49, %51 : vector<8x128xf32>
    %53 = vector.extract_strided_slice %46 {offsets = [0, 128], sizes = [8, 128], strides = [1, 1]} : vector<8x256xf32> to vector<8x128xf32>
    %54 = vector.broadcast %8 : vector<1x128xf32> to vector<8x128xf32>
    %55 = arith.addf %53, %54 : vector<8x128xf32>
    %56 = math.tanh %52 : vector<8x128xf32>
    %57 = arith.negf %52 : vector<8x128xf32>
    %58 = math.exp %57 : vector<8x128xf32>
    %cst_30 = arith.constant 1.000000e+00 : f32
    %59 = vector.broadcast %cst_30 : f32 to vector<8x128xf32>
    %60 = arith.addf %59, %58 : vector<8x128xf32>
    %61 = arith.divf %59, %60 : vector<8x128xf32>
    %62 = arith.select %5, %56, %61 : vector<8x128xi1>, vector<8x128xf32>
    %63 = vector.extract_strided_slice %62 {offsets = [0, 0], sizes = [8, 32], strides = [1, 1]} : vector<8x128xf32> to vector<8x32xf32>
    %64 = vector.extract_strided_slice %62 {offsets = [0, 32], sizes = [8, 32], strides = [1, 1]} : vector<8x128xf32> to vector<8x32xf32>
    %65 = vector.extract_strided_slice %62 {offsets = [0, 64], sizes = [8, 32], strides = [1, 1]} : vector<8x128xf32> to vector<8x32xf32>
    %66 = vector.extract_strided_slice %62 {offsets = [0, 96], sizes = [8, 32], strides = [1, 1]} : vector<8x128xf32> to vector<8x32xf32>
    %67 = arith.mulf %64, %42 : vector<8x32xf32>
    %68 = arith.mulf %63, %65 : vector<8x32xf32>
    %69 = arith.addf %67, %68 : vector<8x32xf32>
    %70 = math.tanh %69 : vector<8x32xf32>
    %71 = arith.mulf %66, %70 : vector<8x32xf32>
    %72 = math.tanh %55 : vector<8x128xf32>
    %73 = arith.negf %55 : vector<8x128xf32>
    %74 = math.exp %73 : vector<8x128xf32>
    %cst_31 = arith.constant 1.000000e+00 : f32
    %75 = vector.broadcast %cst_31 : f32 to vector<8x128xf32>
    %76 = arith.addf %75, %74 : vector<8x128xf32>
    %77 = arith.divf %75, %76 : vector<8x128xf32>
    %78 = arith.select %5, %72, %77 : vector<8x128xi1>, vector<8x128xf32>
    %79 = vector.extract_strided_slice %78 {offsets = [0, 0], sizes = [8, 32], strides = [1, 1]} : vector<8x128xf32> to vector<8x32xf32>
    %80 = vector.extract_strided_slice %78 {offsets = [0, 32], sizes = [8, 32], strides = [1, 1]} : vector<8x128xf32> to vector<8x32xf32>
    %81 = vector.extract_strided_slice %78 {offsets = [0, 64], sizes = [8, 32], strides = [1, 1]} : vector<8x128xf32> to vector<8x32xf32>
    %82 = vector.extract_strided_slice %78 {offsets = [0, 96], sizes = [8, 32], strides = [1, 1]} : vector<8x128xf32> to vector<8x32xf32>
    %83 = arith.mulf %80, %24 : vector<8x32xf32>
    %84 = arith.mulf %79, %81 : vector<8x32xf32>
    %85 = arith.addf %83, %84 : vector<8x32xf32>
    %86 = math.tanh %85 : vector<8x32xf32>
    %87 = arith.mulf %82, %86 : vector<8x32xf32>
    %c1_i32_32 = arith.constant 1 : i32
    %88 = arith.subi %c1_i32, %c1_i32_32 : i32
    %c8_i32_33 = arith.constant 8 : i32
    %89 = arith.muli %88, %c8_i32_33 : i32
    %90 = tpu.assume_multiple %89, 8 : i32
    %91 = arith.index_cast %90 : i32 to index
    %c0_34 = arith.constant 0 : index
    %92 = vector.load %arg11[%91, %c0_34] : memref<64x32xf32, #tpu.memory_space<vmem>>, vector<8x32xf32>
    tpu.vector_store %arg11[%91, %c0_34], %87 {strides = array<i32>} : memref<64x32xf32, #tpu.memory_space<vmem>>, vector<8x32xf32>,
    %c2_i32 = arith.constant 2 : i32
    %93 = tpu.concatenate %71, %87 in 1 : vector<8x32xf32>, vector<8x32xf32> -> vector<8x64xf32>
    %cst_35 = arith.constant dense<0.000000e+00> : vector<8x256xf32>
    %94 = tpu.matmul %93, %6, %cst_35 {dimension_numbers = #tpu.dot_dimension_numbers<[1], [0], [0], [1], [0, 0, 1, 1], [], []>} : vector<8x64xf32>, vector<64x256xf32>, vector<8x256xf32> -> vector<8x256xf32>
    %c8_i32_36 = arith.constant 8 : i32
    %95 = arith.muli %c2_i32, %c8_i32_36 : i32
    %96 = tpu.assume_multiple %95, 8 : i32
    %97 = vector.extract_strided_slice %94 {offsets = [0, 0], sizes = [8, 128], strides = [1, 1]} : vector<8x256xf32> to vector<8x128xf32>
    %98 = arith.index_cast %96 : i32 to index
    %c0_37 = arith.constant 0 : index
    %99 = vector.load %arg12[%98, %c0_37] : memref<64x128xf32, #tpu.memory_space<vmem>>, vector<8x128xf32>
    %100 = arith.addf %97, %99 : vector<8x128xf32>
    %101 = vector.extract_strided_slice %94 {offsets = [0, 128], sizes = [8, 128], strides = [1, 1]} : vector<8x256xf32> to vector<8x128xf32>
    %102 = vector.broadcast %8 : vector<1x128xf32> to vector<8x128xf32>
    %103 = arith.addf %101, %102 : vector<8x128xf32>
    %104 = math.tanh %100 : vector<8x128xf32>
    %105 = arith.negf %100 : vector<8x128xf32>
    %106 = math.exp %105 : vector<8x128xf32>
    %cst_38 = arith.constant 1.000000e+00 : f32
    %107 = vector.broadcast %cst_38 : f32 to vector<8x128xf32>
    %108 = arith.addf %107, %106 : vector<8x128xf32>
    %109 = arith.divf %107, %108 : vector<8x128xf32>
    %110 = arith.select %5, %104, %109 : vector<8x128xi1>, vector<8x128xf32>
    %111 = vector.extract_strided_slice %110 {offsets = [0, 0], sizes = [8, 32], strides = [1, 1]} : vector<8x128xf32> to vector<8x32xf32>
    %112 = vector.extract_strided_slice %110 {offsets = [0, 32], sizes = [8, 32], strides = [1, 1]} : vector<8x128xf32> to vector<8x32xf32>
    %113 = vector.extract_strided_slice %110 {offsets = [0, 64], sizes = [8, 32], strides = [1, 1]} : vector<8x128xf32> to vector<8x32xf32>
    %114 = vector.extract_strided_slice %110 {offsets = [0, 96], sizes = [8, 32], strides = [1, 1]} : vector<8x128xf32> to vector<8x32xf32>
    %115 = arith.mulf %112, %69 : vector<8x32xf32>
    %116 = arith.mulf %111, %113 : vector<8x32xf32>
    %117 = arith.addf %115, %116 : vector<8x32xf32>
    %118 = math.tanh %117 : vector<8x32xf32>
    %119 = arith.mulf %114, %118 : vector<8x32xf32>
    %120 = math.tanh %103 : vector<8x128xf32>
    %121 = arith.negf %103 : vector<8x128xf32>
    %122 = math.exp %121 : vector<8x128xf32>
    %cst_39 = arith.constant 1.000000e+00 : f32
    %123 = vector.broadcast %cst_39 : f32 to vector<8x128xf32>
    %124 = arith.addf %123, %122 : vector<8x128xf32>
    %125 = arith.divf %123, %124 : vector<8x128xf32>
    %126 = arith.select %5, %120, %125 : vector<8x128xi1>, vector<8x128xf32>
    %127 = vector.extract_strided_slice %126 {offsets = [0, 0], sizes = [8, 32], strides = [1, 1]} : vector<8x128xf32> to vector<8x32xf32>
    %128 = vector.extract_strided_slice %126 {offsets = [0, 32], sizes = [8, 32], strides = [1, 1]} : vector<8x128xf32> to vector<8x32xf32>
    %129 = vector.extract_strided_slice %126 {offsets = [0, 64], sizes = [8, 32], strides = [1, 1]} : vector<8x128xf32> to vector<8x32xf32>
    %130 = vector.extract_strided_slice %126 {offsets = [0, 96], sizes = [8, 32], strides = [1, 1]} : vector<8x128xf32> to vector<8x32xf32>
    %131 = arith.mulf %128, %85 : vector<8x32xf32>
    %132 = arith.mulf %127, %129 : vector<8x32xf32>
    %133 = arith.addf %131, %132 : vector<8x32xf32>
    %134 = math.tanh %133 : vector<8x32xf32>
    %135 = arith.mulf %130, %134 : vector<8x32xf32>
    %c1_i32_40 = arith.constant 1 : i32
    %136 = arith.subi %c2_i32, %c1_i32_40 : i32
    %c8_i32_41 = arith.constant 8 : i32
    %137 = arith.muli %136, %c8_i32_41 : i32
    %138 = tpu.assume_multiple %137, 8 : i32
    %139 = arith.index_cast %138 : i32 to index
    %c0_42 = arith.constant 0 : index
    %140 = vector.load %arg11[%139, %c0_42] : memref<64x32xf32, #tpu.memory_space<vmem>>, vector<8x32xf32>
    tpu.vector_store %arg11[%139, %c0_42], %135 {strides = array<i32>} : memref<64x32xf32, #tpu.memory_space<vmem>>, vector<8x32xf32>,
    %c3_i32 = arith.constant 3 : i32
    %141 = tpu.concatenate %119, %135 in 1 : vector<8x32xf32>, vector<8x32xf32> -> vector<8x64xf32>
    %cst_43 = arith.constant dense<0.000000e+00> : vector<8x256xf32>
    %142 = tpu.matmul %141, %6, %cst_43 {dimension_numbers = #tpu.dot_dimension_numbers<[1], [0], [0], [1], [0, 0, 1, 1], [], []>} : vector<8x64xf32>, vector<64x256xf32>, vector<8x256xf32> -> vector<8x256xf32>
    %c8_i32_44 = arith.constant 8 : i32
    %143 = arith.muli %c3_i32, %c8_i32_44 : i32
    %144 = tpu.assume_multiple %143, 8 : i32
    %145 = vector.extract_strided_slice %142 {offsets = [0, 0], sizes = [8, 128], strides = [1, 1]} : vector<8x256xf32> to vector<8x128xf32>
    %146 = arith.index_cast %144 : i32 to index
    %c0_45 = arith.constant 0 : index
    %147 = vector.load %arg12[%146, %c0_45] : memref<64x128xf32, #tpu.memory_space<vmem>>, vector<8x128xf32>
    %148 = arith.addf %145, %147 : vector<8x128xf32>
    %149 = vector.extract_strided_slice %142 {offsets = [0, 128], sizes = [8, 128], strides = [1, 1]} : vector<8x256xf32> to vector<8x128xf32>
    %150 = vector.broadcast %8 : vector<1x128xf32> to vector<8x128xf32>
    %151 = arith.addf %149, %150 : vector<8x128xf32>
    %152 = math.tanh %148 : vector<8x128xf32>
    %153 = arith.negf %148 : vector<8x128xf32>
    %154 = math.exp %153 : vector<8x128xf32>
    %cst_46 = arith.constant 1.000000e+00 : f32
    %155 = vector.broadcast %cst_46 : f32 to vector<8x128xf32>
    %156 = arith.addf %155, %154 : vector<8x128xf32>
    %157 = arith.divf %155, %156 : vector<8x128xf32>
    %158 = arith.select %5, %152, %157 : vector<8x128xi1>, vector<8x128xf32>
    %159 = vector.extract_strided_slice %158 {offsets = [0, 0], sizes = [8, 32], strides = [1, 1]} : vector<8x128xf32> to vector<8x32xf32>
    %160 = vector.extract_strided_slice %158 {offsets = [0, 32], sizes = [8, 32], strides = [1, 1]} : vector<8x128xf32> to vector<8x32xf32>
    %161 = vector.extract_strided_slice %158 {offsets = [0, 64], sizes = [8, 32], strides = [1, 1]} : vector<8x128xf32> to vector<8x32xf32>
    %162 = vector.extract_strided_slice %158 {offsets = [0, 96], sizes = [8, 32], strides = [1, 1]} : vector<8x128xf32> to vector<8x32xf32>
    %163 = arith.mulf %160, %117 : vector<8x32xf32>
    %164 = arith.mulf %159, %161 : vector<8x32xf32>
    %165 = arith.addf %163, %164 : vector<8x32xf32>
    %166 = math.tanh %165 : vector<8x32xf32>
    %167 = arith.mulf %162, %166 : vector<8x32xf32>
    %168 = math.tanh %151 : vector<8x128xf32>
    %169 = arith.negf %151 : vector<8x128xf32>
    %170 = math.exp %169 : vector<8x128xf32>
    %cst_47 = arith.constant 1.000000e+00 : f32
    %171 = vector.broadcast %cst_47 : f32 to vector<8x128xf32>
    %172 = arith.addf %171, %170 : vector<8x128xf32>
    %173 = arith.divf %171, %172 : vector<8x128xf32>
    %174 = arith.select %5, %168, %173 : vector<8x128xi1>, vector<8x128xf32>
    %175 = vector.extract_strided_slice %174 {offsets = [0, 0], sizes = [8, 32], strides = [1, 1]} : vector<8x128xf32> to vector<8x32xf32>
    %176 = vector.extract_strided_slice %174 {offsets = [0, 32], sizes = [8, 32], strides = [1, 1]} : vector<8x128xf32> to vector<8x32xf32>
    %177 = vector.extract_strided_slice %174 {offsets = [0, 64], sizes = [8, 32], strides = [1, 1]} : vector<8x128xf32> to vector<8x32xf32>
    %178 = vector.extract_strided_slice %174 {offsets = [0, 96], sizes = [8, 32], strides = [1, 1]} : vector<8x128xf32> to vector<8x32xf32>
    %179 = arith.mulf %176, %133 : vector<8x32xf32>
    %180 = arith.mulf %175, %177 : vector<8x32xf32>
    %181 = arith.addf %179, %180 : vector<8x32xf32>
    %182 = math.tanh %181 : vector<8x32xf32>
    %183 = arith.mulf %178, %182 : vector<8x32xf32>
    %c1_i32_48 = arith.constant 1 : i32
    %184 = arith.subi %c3_i32, %c1_i32_48 : i32
    %c8_i32_49 = arith.constant 8 : i32
    %185 = arith.muli %184, %c8_i32_49 : i32
    %186 = tpu.assume_multiple %185, 8 : i32
    %187 = arith.index_cast %186 : i32 to index
    %c0_50 = arith.constant 0 : index
    %188 = vector.load %arg11[%187, %c0_50] : memref<64x32xf32, #tpu.memory_space<vmem>>, vector<8x32xf32>
    tpu.vector_store %arg11[%187, %c0_50], %183 {strides = array<i32>} : memref<64x32xf32, #tpu.memory_space<vmem>>, vector<8x32xf32>,
    %c4_i32 = arith.constant 4 : i32
    %189 = tpu.concatenate %167, %183 in 1 : vector<8x32xf32>, vector<8x32xf32> -> vector<8x64xf32>
    %cst_51 = arith.constant dense<0.000000e+00> : vector<8x256xf32>
    %190 = tpu.matmul %189, %6, %cst_51 {dimension_numbers = #tpu.dot_dimension_numbers<[1], [0], [0], [1], [0, 0, 1, 1], [], []>} : vector<8x64xf32>, vector<64x256xf32>, vector<8x256xf32> -> vector<8x256xf32>
    %c8_i32_52 = arith.constant 8 : i32
    %191 = arith.muli %c4_i32, %c8_i32_52 : i32
    %192 = tpu.assume_multiple %191, 8 : i32
    %193 = vector.extract_strided_slice %190 {offsets = [0, 0], sizes = [8, 128], strides = [1, 1]} : vector<8x256xf32> to vector<8x128xf32>
    %194 = arith.index_cast %192 : i32 to index
    %c0_53 = arith.constant 0 : index
    %195 = vector.load %arg12[%194, %c0_53] : memref<64x128xf32, #tpu.memory_space<vmem>>, vector<8x128xf32>
    %196 = arith.addf %193, %195 : vector<8x128xf32>
    %197 = vector.extract_strided_slice %190 {offsets = [0, 128], sizes = [8, 128], strides = [1, 1]} : vector<8x256xf32> to vector<8x128xf32>
    %198 = vector.broadcast %8 : vector<1x128xf32> to vector<8x128xf32>
    %199 = arith.addf %197, %198 : vector<8x128xf32>
    %200 = math.tanh %196 : vector<8x128xf32>
    %201 = arith.negf %196 : vector<8x128xf32>
    %202 = math.exp %201 : vector<8x128xf32>
    %cst_54 = arith.constant 1.000000e+00 : f32
    %203 = vector.broadcast %cst_54 : f32 to vector<8x128xf32>
    %204 = arith.addf %203, %202 : vector<8x128xf32>
    %205 = arith.divf %203, %204 : vector<8x128xf32>
    %206 = arith.select %5, %200, %205 : vector<8x128xi1>, vector<8x128xf32>
    %207 = vector.extract_strided_slice %206 {offsets = [0, 0], sizes = [8, 32], strides = [1, 1]} : vector<8x128xf32> to vector<8x32xf32>
    %208 = vector.extract_strided_slice %206 {offsets = [0, 32], sizes = [8, 32], strides = [1, 1]} : vector<8x128xf32> to vector<8x32xf32>
    %209 = vector.extract_strided_slice %206 {offsets = [0, 64], sizes = [8, 32], strides = [1, 1]} : vector<8x128xf32> to vector<8x32xf32>
    %210 = vector.extract_strided_slice %206 {offsets = [0, 96], sizes = [8, 32], strides = [1, 1]} : vector<8x128xf32> to vector<8x32xf32>
    %211 = arith.mulf %208, %165 : vector<8x32xf32>
    %212 = arith.mulf %207, %209 : vector<8x32xf32>
    %213 = arith.addf %211, %212 : vector<8x32xf32>
    %214 = math.tanh %213 : vector<8x32xf32>
    %215 = arith.mulf %210, %214 : vector<8x32xf32>
    %216 = math.tanh %199 : vector<8x128xf32>
    %217 = arith.negf %199 : vector<8x128xf32>
    %218 = math.exp %217 : vector<8x128xf32>
    %cst_55 = arith.constant 1.000000e+00 : f32
    %219 = vector.broadcast %cst_55 : f32 to vector<8x128xf32>
    %220 = arith.addf %219, %218 : vector<8x128xf32>
    %221 = arith.divf %219, %220 : vector<8x128xf32>
    %222 = arith.select %5, %216, %221 : vector<8x128xi1>, vector<8x128xf32>
    %223 = vector.extract_strided_slice %222 {offsets = [0, 0], sizes = [8, 32], strides = [1, 1]} : vector<8x128xf32> to vector<8x32xf32>
    %224 = vector.extract_strided_slice %222 {offsets = [0, 32], sizes = [8, 32], strides = [1, 1]} : vector<8x128xf32> to vector<8x32xf32>
    %225 = vector.extract_strided_slice %222 {offsets = [0, 64], sizes = [8, 32], strides = [1, 1]} : vector<8x128xf32> to vector<8x32xf32>
    %226 = vector.extract_strided_slice %222 {offsets = [0, 96], sizes = [8, 32], strides = [1, 1]} : vector<8x128xf32> to vector<8x32xf32>
    %227 = arith.mulf %224, %181 : vector<8x32xf32>
    %228 = arith.mulf %223, %225 : vector<8x32xf32>
    %229 = arith.addf %227, %228 : vector<8x32xf32>
    %230 = math.tanh %229 : vector<8x32xf32>
    %231 = arith.mulf %226, %230 : vector<8x32xf32>
    %c1_i32_56 = arith.constant 1 : i32
    %232 = arith.subi %c4_i32, %c1_i32_56 : i32
    %c8_i32_57 = arith.constant 8 : i32
    %233 = arith.muli %232, %c8_i32_57 : i32
    %234 = tpu.assume_multiple %233, 8 : i32
    %235 = arith.index_cast %234 : i32 to index
    %c0_58 = arith.constant 0 : index
    %236 = vector.load %arg11[%235, %c0_58] : memref<64x32xf32, #tpu.memory_space<vmem>>, vector<8x32xf32>
    tpu.vector_store %arg11[%235, %c0_58], %231 {strides = array<i32>} : memref<64x32xf32, #tpu.memory_space<vmem>>, vector<8x32xf32>,
    %c5_i32 = arith.constant 5 : i32
    %237 = tpu.concatenate %215, %231 in 1 : vector<8x32xf32>, vector<8x32xf32> -> vector<8x64xf32>
    %cst_59 = arith.constant dense<0.000000e+00> : vector<8x256xf32>
    %238 = tpu.matmul %237, %6, %cst_59 {dimension_numbers = #tpu.dot_dimension_numbers<[1], [0], [0], [1], [0, 0, 1, 1], [], []>} : vector<8x64xf32>, vector<64x256xf32>, vector<8x256xf32> -> vector<8x256xf32>
    %c8_i32_60 = arith.constant 8 : i32
    %239 = arith.muli %c5_i32, %c8_i32_60 : i32
    %240 = tpu.assume_multiple %239, 8 : i32
    %241 = vector.extract_strided_slice %238 {offsets = [0, 0], sizes = [8, 128], strides = [1, 1]} : vector<8x256xf32> to vector<8x128xf32>
    %242 = arith.index_cast %240 : i32 to index
    %c0_61 = arith.constant 0 : index
    %243 = vector.load %arg12[%242, %c0_61] : memref<64x128xf32, #tpu.memory_space<vmem>>, vector<8x128xf32>
    %244 = arith.addf %241, %243 : vector<8x128xf32>
    %245 = vector.extract_strided_slice %238 {offsets = [0, 128], sizes = [8, 128], strides = [1, 1]} : vector<8x256xf32> to vector<8x128xf32>
    %246 = vector.broadcast %8 : vector<1x128xf32> to vector<8x128xf32>
    %247 = arith.addf %245, %246 : vector<8x128xf32>
    %248 = math.tanh %244 : vector<8x128xf32>
    %249 = arith.negf %244 : vector<8x128xf32>
    %250 = math.exp %249 : vector<8x128xf32>
    %cst_62 = arith.constant 1.000000e+00 : f32
    %251 = vector.broadcast %cst_62 : f32 to vector<8x128xf32>
    %252 = arith.addf %251, %250 : vector<8x128xf32>
    %253 = arith.divf %251, %252 : vector<8x128xf32>
    %254 = arith.select %5, %248, %253 : vector<8x128xi1>, vector<8x128xf32>
    %255 = vector.extract_strided_slice %254 {offsets = [0, 0], sizes = [8, 32], strides = [1, 1]} : vector<8x128xf32> to vector<8x32xf32>
    %256 = vector.extract_strided_slice %254 {offsets = [0, 32], sizes = [8, 32], strides = [1, 1]} : vector<8x128xf32> to vector<8x32xf32>
    %257 = vector.extract_strided_slice %254 {offsets = [0, 64], sizes = [8, 32], strides = [1, 1]} : vector<8x128xf32> to vector<8x32xf32>
    %258 = vector.extract_strided_slice %254 {offsets = [0, 96], sizes = [8, 32], strides = [1, 1]} : vector<8x128xf32> to vector<8x32xf32>
    %259 = arith.mulf %256, %213 : vector<8x32xf32>
    %260 = arith.mulf %255, %257 : vector<8x32xf32>
    %261 = arith.addf %259, %260 : vector<8x32xf32>
    %262 = math.tanh %261 : vector<8x32xf32>
    %263 = arith.mulf %258, %262 : vector<8x32xf32>
    %264 = math.tanh %247 : vector<8x128xf32>
    %265 = arith.negf %247 : vector<8x128xf32>
    %266 = math.exp %265 : vector<8x128xf32>
    %cst_63 = arith.constant 1.000000e+00 : f32
    %267 = vector.broadcast %cst_63 : f32 to vector<8x128xf32>
    %268 = arith.addf %267, %266 : vector<8x128xf32>
    %269 = arith.divf %267, %268 : vector<8x128xf32>
    %270 = arith.select %5, %264, %269 : vector<8x128xi1>, vector<8x128xf32>
    %271 = vector.extract_strided_slice %270 {offsets = [0, 0], sizes = [8, 32], strides = [1, 1]} : vector<8x128xf32> to vector<8x32xf32>
    %272 = vector.extract_strided_slice %270 {offsets = [0, 32], sizes = [8, 32], strides = [1, 1]} : vector<8x128xf32> to vector<8x32xf32>
    %273 = vector.extract_strided_slice %270 {offsets = [0, 64], sizes = [8, 32], strides = [1, 1]} : vector<8x128xf32> to vector<8x32xf32>
    %274 = vector.extract_strided_slice %270 {offsets = [0, 96], sizes = [8, 32], strides = [1, 1]} : vector<8x128xf32> to vector<8x32xf32>
    %275 = arith.mulf %272, %229 : vector<8x32xf32>
    %276 = arith.mulf %271, %273 : vector<8x32xf32>
    %277 = arith.addf %275, %276 : vector<8x32xf32>
    %278 = math.tanh %277 : vector<8x32xf32>
    %279 = arith.mulf %274, %278 : vector<8x32xf32>
    %c1_i32_64 = arith.constant 1 : i32
    %280 = arith.subi %c5_i32, %c1_i32_64 : i32
    %c8_i32_65 = arith.constant 8 : i32
    %281 = arith.muli %280, %c8_i32_65 : i32
    %282 = tpu.assume_multiple %281, 8 : i32
    %283 = arith.index_cast %282 : i32 to index
    %c0_66 = arith.constant 0 : index
    %284 = vector.load %arg11[%283, %c0_66] : memref<64x32xf32, #tpu.memory_space<vmem>>, vector<8x32xf32>
    tpu.vector_store %arg11[%283, %c0_66], %279 {strides = array<i32>} : memref<64x32xf32, #tpu.memory_space<vmem>>, vector<8x32xf32>,
    %c6_i32 = arith.constant 6 : i32
    %285 = tpu.concatenate %263, %279 in 1 : vector<8x32xf32>, vector<8x32xf32> -> vector<8x64xf32>
    %cst_67 = arith.constant dense<0.000000e+00> : vector<8x256xf32>
    %286 = tpu.matmul %285, %6, %cst_67 {dimension_numbers = #tpu.dot_dimension_numbers<[1], [0], [0], [1], [0, 0, 1, 1], [], []>} : vector<8x64xf32>, vector<64x256xf32>, vector<8x256xf32> -> vector<8x256xf32>
    %c8_i32_68 = arith.constant 8 : i32
    %287 = arith.muli %c6_i32, %c8_i32_68 : i32
    %288 = tpu.assume_multiple %287, 8 : i32
    %289 = vector.extract_strided_slice %286 {offsets = [0, 0], sizes = [8, 128], strides = [1, 1]} : vector<8x256xf32> to vector<8x128xf32>
    %290 = arith.index_cast %288 : i32 to index
    %c0_69 = arith.constant 0 : index
    %291 = vector.load %arg12[%290, %c0_69] : memref<64x128xf32, #tpu.memory_space<vmem>>, vector<8x128xf32>
    %292 = arith.addf %289, %291 : vector<8x128xf32>
    %293 = vector.extract_strided_slice %286 {offsets = [0, 128], sizes = [8, 128], strides = [1, 1]} : vector<8x256xf32> to vector<8x128xf32>
    %294 = vector.broadcast %8 : vector<1x128xf32> to vector<8x128xf32>
    %295 = arith.addf %293, %294 : vector<8x128xf32>
    %296 = math.tanh %292 : vector<8x128xf32>
    %297 = arith.negf %292 : vector<8x128xf32>
    %298 = math.exp %297 : vector<8x128xf32>
    %cst_70 = arith.constant 1.000000e+00 : f32
    %299 = vector.broadcast %cst_70 : f32 to vector<8x128xf32>
    %300 = arith.addf %299, %298 : vector<8x128xf32>
    %301 = arith.divf %299, %300 : vector<8x128xf32>
    %302 = arith.select %5, %296, %301 : vector<8x128xi1>, vector<8x128xf32>
    %303 = vector.extract_strided_slice %302 {offsets = [0, 0], sizes = [8, 32], strides = [1, 1]} : vector<8x128xf32> to vector<8x32xf32>
    %304 = vector.extract_strided_slice %302 {offsets = [0, 32], sizes = [8, 32], strides = [1, 1]} : vector<8x128xf32> to vector<8x32xf32>
    %305 = vector.extract_strided_slice %302 {offsets = [0, 64], sizes = [8, 32], strides = [1, 1]} : vector<8x128xf32> to vector<8x32xf32>
    %306 = vector.extract_strided_slice %302 {offsets = [0, 96], sizes = [8, 32], strides = [1, 1]} : vector<8x128xf32> to vector<8x32xf32>
    %307 = arith.mulf %304, %261 : vector<8x32xf32>
    %308 = arith.mulf %303, %305 : vector<8x32xf32>
    %309 = arith.addf %307, %308 : vector<8x32xf32>
    %310 = math.tanh %309 : vector<8x32xf32>
    %311 = arith.mulf %306, %310 : vector<8x32xf32>
    %312 = math.tanh %295 : vector<8x128xf32>
    %313 = arith.negf %295 : vector<8x128xf32>
    %314 = math.exp %313 : vector<8x128xf32>
    %cst_71 = arith.constant 1.000000e+00 : f32
    %315 = vector.broadcast %cst_71 : f32 to vector<8x128xf32>
    %316 = arith.addf %315, %314 : vector<8x128xf32>
    %317 = arith.divf %315, %316 : vector<8x128xf32>
    %318 = arith.select %5, %312, %317 : vector<8x128xi1>, vector<8x128xf32>
    %319 = vector.extract_strided_slice %318 {offsets = [0, 0], sizes = [8, 32], strides = [1, 1]} : vector<8x128xf32> to vector<8x32xf32>
    %320 = vector.extract_strided_slice %318 {offsets = [0, 32], sizes = [8, 32], strides = [1, 1]} : vector<8x128xf32> to vector<8x32xf32>
    %321 = vector.extract_strided_slice %318 {offsets = [0, 64], sizes = [8, 32], strides = [1, 1]} : vector<8x128xf32> to vector<8x32xf32>
    %322 = vector.extract_strided_slice %318 {offsets = [0, 96], sizes = [8, 32], strides = [1, 1]} : vector<8x128xf32> to vector<8x32xf32>
    %323 = arith.mulf %320, %277 : vector<8x32xf32>
    %324 = arith.mulf %319, %321 : vector<8x32xf32>
    %325 = arith.addf %323, %324 : vector<8x32xf32>
    %326 = math.tanh %325 : vector<8x32xf32>
    %327 = arith.mulf %322, %326 : vector<8x32xf32>
    %c1_i32_72 = arith.constant 1 : i32
    %328 = arith.subi %c6_i32, %c1_i32_72 : i32
    %c8_i32_73 = arith.constant 8 : i32
    %329 = arith.muli %328, %c8_i32_73 : i32
    %330 = tpu.assume_multiple %329, 8 : i32
    %331 = arith.index_cast %330 : i32 to index
    %c0_74 = arith.constant 0 : index
    %332 = vector.load %arg11[%331, %c0_74] : memref<64x32xf32, #tpu.memory_space<vmem>>, vector<8x32xf32>
    tpu.vector_store %arg11[%331, %c0_74], %327 {strides = array<i32>} : memref<64x32xf32, #tpu.memory_space<vmem>>, vector<8x32xf32>,
    %c7_i32 = arith.constant 7 : i32
    %333 = tpu.concatenate %311, %327 in 1 : vector<8x32xf32>, vector<8x32xf32> -> vector<8x64xf32>
    %cst_75 = arith.constant dense<0.000000e+00> : vector<8x256xf32>
    %334 = tpu.matmul %333, %6, %cst_75 {dimension_numbers = #tpu.dot_dimension_numbers<[1], [0], [0], [1], [0, 0, 1, 1], [], []>} : vector<8x64xf32>, vector<64x256xf32>, vector<8x256xf32> -> vector<8x256xf32>
    %c8_i32_76 = arith.constant 8 : i32
    %335 = arith.muli %c7_i32, %c8_i32_76 : i32
    %336 = tpu.assume_multiple %335, 8 : i32
    %337 = vector.extract_strided_slice %334 {offsets = [0, 0], sizes = [8, 128], strides = [1, 1]} : vector<8x256xf32> to vector<8x128xf32>
    %338 = arith.index_cast %336 : i32 to index
    %c0_77 = arith.constant 0 : index
    %339 = vector.load %arg12[%338, %c0_77] : memref<64x128xf32, #tpu.memory_space<vmem>>, vector<8x128xf32>
    %340 = arith.addf %337, %339 : vector<8x128xf32>
    %341 = vector.extract_strided_slice %334 {offsets = [0, 128], sizes = [8, 128], strides = [1, 1]} : vector<8x256xf32> to vector<8x128xf32>
    %342 = vector.broadcast %8 : vector<1x128xf32> to vector<8x128xf32>
    %343 = arith.addf %341, %342 : vector<8x128xf32>
    %344 = math.tanh %340 : vector<8x128xf32>
    %345 = arith.negf %340 : vector<8x128xf32>
    %346 = math.exp %345 : vector<8x128xf32>
    %cst_78 = arith.constant 1.000000e+00 : f32
    %347 = vector.broadcast %cst_78 : f32 to vector<8x128xf32>
    %348 = arith.addf %347, %346 : vector<8x128xf32>
    %349 = arith.divf %347, %348 : vector<8x128xf32>
    %350 = arith.select %5, %344, %349 : vector<8x128xi1>, vector<8x128xf32>
    %351 = vector.extract_strided_slice %350 {offsets = [0, 0], sizes = [8, 32], strides = [1, 1]} : vector<8x128xf32> to vector<8x32xf32>
    %352 = vector.extract_strided_slice %350 {offsets = [0, 32], sizes = [8, 32], strides = [1, 1]} : vector<8x128xf32> to vector<8x32xf32>
    %353 = vector.extract_strided_slice %350 {offsets = [0, 64], sizes = [8, 32], strides = [1, 1]} : vector<8x128xf32> to vector<8x32xf32>
    %354 = vector.extract_strided_slice %350 {offsets = [0, 96], sizes = [8, 32], strides = [1, 1]} : vector<8x128xf32> to vector<8x32xf32>
    %355 = arith.mulf %352, %309 : vector<8x32xf32>
    %356 = arith.mulf %351, %353 : vector<8x32xf32>
    %357 = arith.addf %355, %356 : vector<8x32xf32>
    %358 = math.tanh %357 : vector<8x32xf32>
    %359 = arith.mulf %354, %358 : vector<8x32xf32>
    %360 = math.tanh %343 : vector<8x128xf32>
    %361 = arith.negf %343 : vector<8x128xf32>
    %362 = math.exp %361 : vector<8x128xf32>
    %cst_79 = arith.constant 1.000000e+00 : f32
    %363 = vector.broadcast %cst_79 : f32 to vector<8x128xf32>
    %364 = arith.addf %363, %362 : vector<8x128xf32>
    %365 = arith.divf %363, %364 : vector<8x128xf32>
    %366 = arith.select %5, %360, %365 : vector<8x128xi1>, vector<8x128xf32>
    %367 = vector.extract_strided_slice %366 {offsets = [0, 0], sizes = [8, 32], strides = [1, 1]} : vector<8x128xf32> to vector<8x32xf32>
    %368 = vector.extract_strided_slice %366 {offsets = [0, 32], sizes = [8, 32], strides = [1, 1]} : vector<8x128xf32> to vector<8x32xf32>
    %369 = vector.extract_strided_slice %366 {offsets = [0, 64], sizes = [8, 32], strides = [1, 1]} : vector<8x128xf32> to vector<8x32xf32>
    %370 = vector.extract_strided_slice %366 {offsets = [0, 96], sizes = [8, 32], strides = [1, 1]} : vector<8x128xf32> to vector<8x32xf32>
    %371 = arith.mulf %368, %325 : vector<8x32xf32>
    %372 = arith.mulf %367, %369 : vector<8x32xf32>
    %373 = arith.addf %371, %372 : vector<8x32xf32>
    %374 = math.tanh %373 : vector<8x32xf32>
    %375 = arith.mulf %370, %374 : vector<8x32xf32>
    %c1_i32_80 = arith.constant 1 : i32
    %376 = arith.subi %c7_i32, %c1_i32_80 : i32
    %c8_i32_81 = arith.constant 8 : i32
    %377 = arith.muli %376, %c8_i32_81 : i32
    %378 = tpu.assume_multiple %377, 8 : i32
    %379 = arith.index_cast %378 : i32 to index
    %c0_82 = arith.constant 0 : index
    %380 = vector.load %arg11[%379, %c0_82] : memref<64x32xf32, #tpu.memory_space<vmem>>, vector<8x32xf32>
    tpu.vector_store %arg11[%379, %c0_82], %375 {strides = array<i32>} : memref<64x32xf32, #tpu.memory_space<vmem>>, vector<8x32xf32>,
    %c7_i32_83 = arith.constant 7 : i32
    %381 = tpu.concatenate %359, %375 in 1 : vector<8x32xf32>, vector<8x32xf32> -> vector<8x64xf32>
    %382 = vector.extract_strided_slice %6 {offsets = [0, 128], sizes = [64, 128], strides = [1, 1]} : vector<64x256xf32> to vector<64x128xf32>
    %cst_84 = arith.constant dense<0.000000e+00> : vector<8x128xf32>
    %383 = tpu.matmul %381, %382, %cst_84 {dimension_numbers = #tpu.dot_dimension_numbers<[1], [0], [0], [1], [0, 0, 1, 1], [], []>} : vector<8x64xf32>, vector<64x128xf32>, vector<8x128xf32> -> vector<8x128xf32>
    %384 = vector.broadcast %8 : vector<1x128xf32> to vector<8x128xf32>
    %385 = arith.addf %383, %384 : vector<8x128xf32>
    %386 = math.tanh %385 : vector<8x128xf32>
    %387 = arith.negf %385 : vector<8x128xf32>
    %388 = math.exp %387 : vector<8x128xf32>
    %cst_85 = arith.constant 1.000000e+00 : f32
    %389 = vector.broadcast %cst_85 : f32 to vector<8x128xf32>
    %390 = arith.addf %389, %388 : vector<8x128xf32>
    %391 = arith.divf %389, %390 : vector<8x128xf32>
    %392 = arith.select %5, %386, %391 : vector<8x128xi1>, vector<8x128xf32>
    %393 = vector.extract_strided_slice %392 {offsets = [0, 0], sizes = [8, 32], strides = [1, 1]} : vector<8x128xf32> to vector<8x32xf32>
    %394 = vector.extract_strided_slice %392 {offsets = [0, 32], sizes = [8, 32], strides = [1, 1]} : vector<8x128xf32> to vector<8x32xf32>
    %395 = vector.extract_strided_slice %392 {offsets = [0, 64], sizes = [8, 32], strides = [1, 1]} : vector<8x128xf32> to vector<8x32xf32>
    %396 = vector.extract_strided_slice %392 {offsets = [0, 96], sizes = [8, 32], strides = [1, 1]} : vector<8x128xf32> to vector<8x32xf32>
    %397 = arith.mulf %394, %373 : vector<8x32xf32>
    %398 = arith.mulf %393, %395 : vector<8x32xf32>
    %399 = arith.addf %397, %398 : vector<8x32xf32>
    %400 = math.tanh %399 : vector<8x32xf32>
    %401 = arith.mulf %396, %400 : vector<8x32xf32>
    %c56_i32 = arith.constant 56 : i32
    %402 = tpu.assume_multiple %c56_i32, 8 : i32
    %403 = arith.index_cast %402 : i32 to index
    %c0_86 = arith.constant 0 : index
    %404 = vector.load %arg11[%403, %c0_86] : memref<64x32xf32, #tpu.memory_space<vmem>>, vector<8x32xf32>
    tpu.vector_store %arg11[%403, %c0_86], %401 {strides = array<i32>} : memref<64x32xf32, #tpu.memory_space<vmem>>, vector<8x32xf32>,
    %c0_87 = arith.constant 0 : index
    %c0_88 = arith.constant 0 : index
    %c0_89 = arith.constant 0 : index
    %405 = vector.load %arg9[%c0_87, %c0_88, %c0_89] : memref<2x8x32xf32, #tpu.memory_space<vmem>>, vector<1x8x32xf32>
    %406 = vector.shape_cast %405 : vector<1x8x32xf32> to vector<8x32xf32>
    %407 = vector.shape_cast %359 : vector<8x32xf32> to vector<1x8x32xf32>
    tpu.vector_store %arg9[%c0_87, %c0_88, %c0_89], %407 {strides = array<i32>} : memref<2x8x32xf32, #tpu.memory_space<vmem>>, vector<1x8x32xf32>,
    %c0_90 = arith.constant 0 : index
    %c0_91 = arith.constant 0 : index
    %c0_92 = arith.constant 0 : index
    %408 = vector.load %arg10[%c0_90, %c0_91, %c0_92] : memref<2x8x32xf32, #tpu.memory_space<vmem>>, vector<1x8x32xf32>
    %409 = vector.shape_cast %408 : vector<1x8x32xf32> to vector<8x32xf32>
    %410 = vector.shape_cast %357 : vector<8x32xf32> to vector<1x8x32xf32>
    tpu.vector_store %arg10[%c0_90, %c0_91, %c0_92], %410 {strides = array<i32>} : memref<2x8x32xf32, #tpu.memory_space<vmem>>, vector<1x8x32xf32>,
    %c1_93 = arith.constant 1 : index
    %c0_94 = arith.constant 0 : index
    %c0_95 = arith.constant 0 : index
    %411 = vector.load %arg9[%c1_93, %c0_94, %c0_95] : memref<2x8x32xf32, #tpu.memory_space<vmem>>, vector<1x8x32xf32>
    %412 = vector.shape_cast %411 : vector<1x8x32xf32> to vector<8x32xf32>
    %413 = vector.shape_cast %401 : vector<8x32xf32> to vector<1x8x32xf32>
    tpu.vector_store %arg9[%c1_93, %c0_94, %c0_95], %413 {strides = array<i32>} : memref<2x8x32xf32, #tpu.memory_space<vmem>>, vector<1x8x32xf32>,
    %c1_96 = arith.constant 1 : index
    %c0_97 = arith.constant 0 : index
    %c0_98 = arith.constant 0 : index
    %414 = vector.load %arg10[%c1_96, %c0_97, %c0_98] : memref<2x8x32xf32, #tpu.memory_space<vmem>>, vector<1x8x32xf32>
    %415 = vector.shape_cast %414 : vector<1x8x32xf32> to vector<8x32xf32>
    %416 = vector.shape_cast %399 : vector<8x32xf32> to vector<1x8x32xf32>
    tpu.vector_store %arg10[%c1_96, %c0_97, %c0_98], %416 {strides = array<i32>} : memref<2x8x32xf32, #tpu.memory_space<vmem>>, vector<1x8x32xf32>,
    %c0_99 = arith.constant 0 : index
    %c0_100 = arith.constant 0 : index
    %417 = vector.load %arg11[%c0_99, %c0_100] : memref<64x32xf32, #tpu.memory_space<vmem>>, vector<64x32xf32>
    %c0_101 = arith.constant 0 : index
    %c0_102 = arith.constant 0 : index
    %418 = vector.load %arg6[%c0_101, %c0_102] : memref<32x128xf32, #tpu.memory_space<vmem>>, vector<32x128xf32>
    %cst_103 = arith.constant dense<0.000000e+00> : vector<64x128xf32>
    %419 = tpu.matmul %417, %418, %cst_103 {dimension_numbers = #tpu.dot_dimension_numbers<[1], [0], [0], [1], [0, 0, 1, 1], [], []>} : vector<64x32xf32>, vector<32x128xf32>, vector<64x128xf32> -> vector<64x128xf32>
    %c0_104 = arith.constant 0 : index
    %c0_105 = arith.constant 0 : index
    %420 = vector.load %arg7[%c0_104, %c0_105] : memref<1x128xf32, #tpu.memory_space<vmem>>, vector<1x128xf32>
    %421 = vector.broadcast %420 : vector<1x128xf32> to vector<64x128xf32>
    %422 = arith.addf %419, %421 : vector<64x128xf32>
    %c0_106 = arith.constant 0 : index
    %c0_107 = arith.constant 0 : index
    %423 = vector.load %arg8[%c0_106, %c0_107] : memref<64x128xf32, #tpu.memory_space<vmem>>, vector<64x128xf32>
    tpu.vector_store %arg8[%c0_106, %c0_107], %422 {strides = array<i32>} : memref<64x128xf32, #tpu.memory_space<vmem>>, vector<64x128xf32>,
    return
  }
}

</mosaic_0001>

<bundles_post_ra>
// kernel: tpu_custom_call.1
= control target key start
LH: loop header
LB: loop body
LE: loop exit
PB: predicated region body
PF: predicated region fallthrough
CT: control target
= control target key end

     0   :  { %16 = vsyncpa [#allocation5], 0  ;;  %s2640_s0 = inlined_call_operand.vmem [shape: f32[64,16], index: 0, kind: input, shape index: {}]   ;;  %s2641_s1 = inlined_call_operand.vmem [shape: f32[2,8,32], index: 1, kind: input, shape index: {}]   ;;  %s2642_s2 = inlined_call_operand.vmem [shape: f32[2,8,32], index: 2, kind: input, shape index: {}]   ;;  %s2643_s3 = inlined_call_operand.vmem [shape: f32[16,128], index: 3, kind: input, shape index: {}]   ;;  %s2644_s4 = inlined_call_operand.hbm [shape: f32[64,256], index: 4, kind: input, shape index: {}]   ;;  %s2645_s5 = inlined_call_operand.vmem [shape: f32[2,1,128], index: 5, kind: input, shape index: {}]   ;;  %s2646_s6 = inlined_call_operand.vmem [shape: f32[32,128], index: 6, kind: input, shape index: {}]   ;;  %s2647_s7 = inlined_call_operand.vmem [shape: f32[1,128], index: 7, kind: input, shape index: {}]   ;;  %s2648_s8 = inlined_call_operand.hbm [shape: f32[64,128], index: 8, kind: output, shape index: {0}]   ;;  %s2649_s9 = inlined_call_operand.hbm [shape: f32[2,8,32], index: 9, kind: output, shape index: {1}]   ;;  %s2650_s10 = inlined_call_operand.hbm [shape: f32[2,8,32], index: 10, kind: output, shape index: {2}]  }
   0x1   :  { %17 = vsyncpa [#allocation6], 0 }
   0x2   :  { %18 = vsyncpa [#allocation9], 0  ;;  %s2047_s13 = smov [#allocation4]  }
   0x3   :  { %s32_s14 = sshll.u32 %s2047_s13, 4  ;;  %s33_s14 = int_to_ptr.vmem [resolvable:$true] %s32_s14 }
   0x4   :  { %s1969_s15 = scalar_lea.vmem %s33_s14, 2048  ;;  %p1974_p1 = scmp.lt.s32.totalorder %s33_s14, %s33_s14 }
   0x5   :  { %p1970_p0 = scmp.ne.s32.totalorder %s33_s14, %s1969_s15  ;;  %p1975_p2 = scmp.lt.s32.totalorder %s1969_s15, %s1969_s15 }
   0x7   :  { %p1976_p3 = por %p1975_p2, %p1974_p1 }
   0x9   :  { %p1977_p4 = pnand %p1976_p3, %p1970_p0 }
   0xb   :  { %1980 = shalt.err (!%p1977_p4)
}
   0xc   :  { %s2048_s16 = smov 256   ;;  %s2049_s17 = smov 16  }
   0xd   :  { %38 = dma.hbm_to_vmem [thread:$0]  %s2644_s4, 2048, %s33_s14, [#allocation5], %s2048_s16, %s2048_s16, %s2049_s17  }
   0xe   :  { %2041 = dma.done.wait [#allocation5], 2048  }
   0xf   :  { %2042 = vsyncadd [#allocation5], 4294965248  ;;  %v2050_v0 = vmov 0.0   ;;  %vm88_vm0 = vcmask 130048   ;;  %v80_v1 = vld [vmem:[%s2643_s3 + $0x8] sm:$0xff]  ;;  %v79_v2 = vld [vmem:[%s2643_s3] sm:$0xff]  ;;  %v48_v39 = vlaneseq }
  0x10   :  { %413 = vmatprep.mubr.f32.mxu0 %v2050_v0  ;;  %v71_v3 = vld [vmem:[%s2640_s0] sm:$0xff]  ;;  %1754 = vmatprep.subr.mxu1 %v80_v1  ;;  %v72_v4 = vld [vmem:[%s2640_s0 + $0x8] sm:$0xff]  ;;  %v2132_v5 = vld [vmem:[#allocation4 + $0x30] sm:$0xff]  ;;  %vm2051_vm1 = vmmov 0   ;;  %vm233_vm2 = vcmask 261120   ;;  %s2053_s24 = smov 32  }
  0x11   :  { %1758 = vmatprep.mubr.msk.f32.mxu1 %vm88_vm0, %v71_v3  ;;  %1755 = vmatpush3.msra.mxu1 %v80_v1  ;;  %v73_v6 = vld [vmem:[%s2640_s0 + $0x10] sm:$0xff]  ;;  %v2139_v7 = vld [vmem:[#allocation4 + $0x20] sm:$0xff]  ;;  %v74_v8 = vld [vmem:[%s2640_s0 + $0x18] sm:$0xff]  ;;  %v49_v40 = vand.u32 127, %v48_v39  ;;  %vm345_vm6 = vcmask 523264  }
  0x12   :  { %1756 = vmatprep.subr.mxu1 %v79_v2  ;;  %v75_v9 = vld [vmem:[%s2640_s0 + $0x20] sm:$0xff]  ;;  %v2150_v10 = vld [vmem:[#allocation4 + $0x10] sm:$0xff]  ;;  %v76_v12 = vld [vmem:[%s2640_s0 + $0x28] sm:$0xff] }
  0x13   :  { %1757 = vmatpush3.msra.mxu1 %v79_v2  ;;  %v2155_v11 = vld [vmem:[#allocation4] sm:$0xff]  ;;  %v77_v13 = vld [vmem:[%s2640_s0 + $0x30] sm:$0xff]  ;;  %v78_v14 = vld [vmem:[%s2640_s0 + $0x38] sm:$0xff]  ;;  %vm50_vm3 = vcmp.ge.s32.totalorder %v49_v40, 64  ;;  %vm51_vm4 = vcmp.lt.s32.totalorder %v49_v40, 96  ;;  %s2052_s0 = smov 64  }
  0x14   :  { %1759 = vmatmul.mubr.msk.f32.vlgmr.msra.gmra.mxu1 %vm88_vm0, %v72_v4  ;;  %1770 = vmatprep.subr.mxu1 %v2050_v0  ;;  %v226_v15 = vld [vmem:[%s2641_s1] sm:$0xff]  ;;  %vm2197_vm5 = vmand %vm50_vm3, %vm51_vm4  ;;  %v2217_v52 = vld [vmem:[#allocation4 + $0x78] sm:$0xff] }
  0x15   :  { %1771 = vmatpush3.msra.mxu1 %v2132_v5  ;;  %1761 = vmatprep.mubr.msk.f32.mxu1 %vm88_vm0, %v73_v6  ;;  %v1672_v16 = vld [vmem:[%s2645_s5] ss:$0 sm:$0xff]  ;;  %v2219_v53 = vld [vmem:[#allocation4 + $0x70] sm:$0xff]  ;;  %v2221_v54 = vld [vmem:[#allocation4 + $0x68] sm:$0xff] }
  0x16   :  { %1772 = vmatprep.subr.mxu1 %v2050_v0  ;;  %v227_v45 = vld [vmem:[%s2642_s2] sm:$0xff]  ;;  %365 = vmatprep.subr.mxu0 %v2217_v52  ;;  %v2228_v56 = vld [vmem:[#allocation4 + $0x58] sm:$0xff]  ;;  %v2232_v57 = vld [vmem:[#allocation4 + $0x50] sm:$0xff] }
  0x17   :  { %1773 = vmatpush3.msra.mxu1 %v2139_v7  ;;  %v2224_v55 = vld [vmem:[#allocation4 + $0x60] sm:$0xff]  ;;  %366 = vmatpush1.msra.mxu0 %v2219_v53  ;;  %v2236_v58 = vld [vmem:[#allocation4 + $0x48] sm:$0xff]  ;;  %v2244_v60 = vld [vmem:[#allocation4 + $0x38] sm:$0xff] }
  0x18   :  { %1762 = vmatmul.mubr.msk.f32.gmra.mxu1 %vm88_vm0, %v74_v8  ;;  %1774 = vmatprep.subr.mxu1 %v2050_v0  ;;  %v2240_v59 = vld [vmem:[#allocation4 + $0x40] sm:$0xff]  ;;  %v2250_v61 = vld [vmem:[#allocation4 + $0x28] sm:$0xff]  ;;  %v2256_v63 = vld [vmem:[#allocation4 + $0x18] sm:$0xff] }
  0x19   :  { %1764 = vmatprep.mubr.msk.f32.mxu1 %vm88_vm0, %v75_v9  ;;  %1775 = vmatpush3.msra.mxu1 %v2150_v10  ;;  %v1681_v1 = vld [vmem:[%s2641_s1 + $0x8] sm:$0xff] }
  0x1a   :  { %1776 = vmatprep.subr.mxu1 %v2050_v0  ;;  %367 = vmatprep.subr.mxu0 %v2221_v54  ;;  %v2265_v2 = vld [vmem:[#allocation4 + $0x8] sm:$0xff] }
  0x1b   :  { %1777 = vmatpush3.msra.mxu1 %v2155_v11  ;;  %368 = vmatpush1.msra.mxu0 %v2224_v55 }
  0x1c   :  { %1765 = vmatmul.mubr.msk.f32.gmra.mxu1 %vm88_vm0, %v76_v12  ;;  %516 = vmatprep.subr.mxu1 %v2217_v52 }
  0x1d   :  { %1767 = vmatprep.mubr.msk.f32.mxu1 %vm88_vm0, %v77_v13  ;;  %369 = vmatprep.subr.mxu0 %v2228_v56  ;;  %v2304_v13 = vld [vmem:[%s2645_s5 + $0x1] ss:$0 sm:$0xff] }
  0x1e   :  { %370 = vmatpush1.msra.mxu0 %v2232_v57 }
  0x1f   :  { %371 = vmatprep.subr.mxu0 %v2236_v58 }
  0x20   :  { %1768 = vmatmul.mubr.msk.f32.gmra.mxu1 %vm88_vm0, %v78_v14  ;;  %372 = vmatpush1.msra.mxu0 %v2240_v59 }
  0x21   :  { %1778 = vmatprep.mubr.msk.f32.mxu1 %vm2051_vm1, %v2050_v0  ;;  %373 = vmatprep.subr.mxu0 %v2244_v60 }
  0x22   :  { %374 = vmatpush1.msra.mxu0 %v2132_v5 }
  0x23   :  { %375 = vmatprep.subr.mxu0 %v2250_v61 }
  0x24   :  { %1779 = vmatmul.mubr.msk.f32.vlgmr.msra.gmra.mxu1 %vm233_vm2, %v226_v15  ;;  %376 = vmatpush1.msra.mxu0 %v2139_v7 }
  0x25   :  { %564 = vmatprep.mubr.f32.mxu1 %v2050_v0  ;;  %517 = vmatpush1.msra.mxu1 %v2219_v53 }
  0x26   :  { %518 = vmatprep.subr.mxu1 %v2221_v54  ;;  %377 = vmatprep.subr.mxu0 %v2256_v63 }
  0x27   :  { %519 = vmatpush1.msra.mxu1 %v2224_v55  ;;  %378 = vmatpush1.msra.mxu0 %v2150_v10 }
  0x28   :  { %520 = vmatprep.subr.mxu1 %v2228_v56  ;;  %379 = vmatprep.subr.mxu0 %v2265_v2 }
  0x29   :  { %521 = vmatpush1.msra.mxu1 %v2232_v57  ;;  %380 = vmatpush1.msra.mxu0 %v2155_v11 }
  0x2a   :  { %522 = vmatprep.subr.mxu1 %v2236_v58  ;;  %658 = vmatprep.subr.mxu0 %v2217_v52 }
  0x2b   :  { %523 = vmatpush1.msra.mxu1 %v2240_v59 }
  0x2c   :  { %524 = vmatprep.subr.mxu1 %v2244_v60 }
  0x2d   :  { %525 = vmatpush1.msra.mxu1 %v2132_v5 }
  0x2e   :  { %526 = vmatprep.subr.mxu1 %v2250_v61 }
  0x2f   :  { %527 = vmatpush1.msra.mxu1 %v2139_v7 }
  0x30   :  { %528 = vmatprep.subr.mxu1 %v2256_v63 }
  0x31   :  { %529 = vmatpush1.msra.mxu1 %v2150_v10 }
  0x32   :  { %530 = vmatprep.subr.mxu1 %v2265_v2 }
  0x33   :  { %531 = vmatpush1.msra.mxu1 %v2155_v11 }
  0x34   :  { %800 = vmatprep.subr.mxu1 %v2217_v52 }
  0xd4   :  { %v1760_v17 = vpop.f32.mrf.mxu1 }
  0xd5   :  { %v2183_v18 = vadd.f32 %v1760_v17, %v1672_v16 }
  0xd6   :  { %v179_v19 = vpop.f32.mrf.mxu1 }
  0xd7   :  { %v180_v31 = vadd.f32 %v1672_v16, %v179_v19 }
  0xd8   :  { %v1763_v20 = vpop.f32.mrf.mxu1 }
  0xd9   :  { %v2185_v21 = vadd.f32 %v1763_v20, %v1672_v16 }
  0xda   :  { %v189_v22 = vpop.f32.mrf.mxu1 }
  0xdb   :  { %v2187_v23 = vadd.f32 %v1672_v16, %v189_v22 }
  0xdc   :  { %v1766_v24 = vpop.f32.mrf.mxu1 }
  0xdd   :  { %v2189_v25 = vadd.f32 %v1766_v24, %v1672_v16 }
  0xde   :  { %v199_v26 = vpop.f32.mrf.mxu1 }
  0xdf   :  { %v2191_v27 = vadd.f32 %v1672_v16, %v199_v26 }
  0xe0   :  { %v1769_v28 = vpop.f32.mrf.mxu1 }
  0xe1   :  { %v2193_v29 = vadd.f32 %v1769_v28, %v1672_v16 }
  0xe2   :  { %v209_v30 = vpop.f32.mrf.mxu1 }
  0xe3   :  { %v2195_v32 = vadd.f32 %v1672_v16, %v209_v30 }
  0xe4   :  { %v303_v33 = vpop.f32.mrf.mxu1 }
  0xe5   :  { %v304_v34 = vadd.f32 %v303_v33, %v180_v31 }
  0xe6   :  { %v1780_v35 = vpop.f32.mrf.mxu1 }
  0xe7   :  { %v1684_v36 = vmul.f32 -1.442695, %v304_v34  ;;  %v1682_v35 = vld [vmem:[%s2642_s2 + $0x8] sm:$0xff]  ;;  %s2054_s2 = smov 96  }
  0xe9   :  { %1833 = vpow2.f32 %v1684_v36 }
  0xea   :  { %1835 = vtanh.f32 %v304_v34 }
  0xf6   :  { %v1834_v37 = vpop.eup %1833 }
  0xf7   :  { %v311_v38 = vadd.f32 1.0, %v1834_v37  ;;  %v1836_v42 = vpop.eup %1835 }
  0xf9   :  { %1837 = vrcp.f32 %v311_v38 }
 0x106   :  { %v1838_v43 = vpop.eup %1837 }
 0x107   :  { %v2203_v44 = vsel %vm2197_vm5, %v1836_v42, %v1838_v43 }
 0x108   :  { %321 = vrot.lane.b32.xlu0 %v2203_v44, %s2052_s0 }
 0x10c   :  { %316 = vrot.lane.b32.xlu0 %v227_v45, %s2053_s24 }
 0x17a   :  { %v322_v46 = vpop.permute.xlu0 %321 }
 0x17b   :  { %v324_v47 = vmul.f32 %v322_v46, %v2203_v44 }
 0x17d   :  { %326 = vrot.lane.b32.xlu1 %v324_v47, %s2053_s24 }
 0x17e   :  { %v317_v48 = vpop.permute.xlu0 %316 }
 0x17f   :  { %v319_v49 = vmul.f32 %v317_v48, %v2203_v44 }
 0x1ef   :  { %v327_v50 = vpop.permute.xlu1 %326 }
 0x1f0   :  { %v2214_v51 = vadd.f32 %v327_v50, %v319_v49 }
 0x1f2   :  { %1839 = vtanh.f32 %v2214_v51 }
 0x1ff   :  { %v1840_v62 = vpop.eup %1839 }
 0x200   :  { %332 = vrot.lane.b32.xlu1 %v1840_v62, %s2052_s0 }
 0x204   :  { %341 = vrot.lane.b32.xlu1 %v1681_v1, %s2053_s24 }
 0x272   :  { %v333_v3 = vpop.permute.xlu1 %332 }
 0x273   :  { %v335_v4 = vmul.f32 %v333_v3, %v2203_v44 }
 0x275   :  { %337 = vrot.lane.b32.xlu0 %v335_v4, %s2053_s24 }
 0x276   :  { %v342_v6 = vpop.permute.xlu1 %341 }
 0x2e7   :  { %v338_v8 = vpop.permute.xlu0 %337 }
 0x2e8   :  { %v344_v9 = vsel %vm233_vm2, %v338_v8, %v342_v6 }
 0x2e9   :  { %1685 = vmatmul.mubr.msk.f32.vlgmr.msra.gmra.mxu0 %vm345_vm6, %v344_v9 }
 0x2ea   :  { %659 = vmatpush1.msra.mxu0 %v2219_v53  ;;  %706 = vmatprep.mubr.f32.mxu0 %v2050_v0 }
 0x2eb   :  { %660 = vmatprep.subr.mxu0 %v2221_v54 }
 0x2ec   :  { %661 = vmatpush1.msra.mxu0 %v2224_v55 }
 0x2ed   :  { %662 = vmatprep.subr.mxu0 %v2228_v56 }
 0x2ee   :  { %663 = vmatpush1.msra.mxu0 %v2232_v57 }
 0x2ef   :  { %664 = vmatprep.subr.mxu0 %v2236_v58 }
 0x2f0   :  { %665 = vmatpush1.msra.mxu0 %v2240_v59 }
 0x2f1   :  { %666 = vmatprep.subr.mxu0 %v2244_v60 }
 0x2f2   :  { %667 = vmatpush1.msra.mxu0 %v2132_v5 }
 0x2f3   :  { %668 = vmatprep.subr.mxu0 %v2250_v61 }
 0x2f4   :  { %669 = vmatpush1.msra.mxu0 %v2139_v7 }
 0x2f5   :  { %670 = vmatprep.subr.mxu0 %v2256_v63 }
 0x2f6   :  { %671 = vmatpush1.msra.mxu0 %v2150_v10 }
 0x2f7   :  { %672 = vmatprep.subr.mxu0 %v2265_v2 }
 0x2f8   :  { %673 = vmatpush1.msra.mxu0 %v2155_v11 }
 0x2f9   :  { %942 = vmatprep.subr.mxu0 %v2217_v52 }
 0x3a9   :  { %v415_v12 = vpop.f32.mrf.mxu0 }
 0x3aa   :  { %v422_v14 = vadd.f32 %v415_v12, %v2183_v18 }
 0x3ab   :  { %v417_v15 = vpop.f32.mrf.mxu0 }
 0x3ac   :  { %v1687_v16 = vmul.f32 -1.442695, %v422_v14  ;;  %v429_v17 = vadd.f32 %v2304_v13, %v417_v15 }
 0x3ae   :  { %1841 = vpow2.f32 %v1687_v16  ;;  %v1688_v19 = vmul.f32 -1.442695, %v429_v17 }
 0x3b0   :  { %1843 = vpow2.f32 %v1688_v19 }
 0x3b1   :  { %1845 = vtanh.f32 %v422_v14 }
 0x3bb   :  { %v1842_v20 = vpop.eup %1841 }
 0x3bc   :  { %v434_v22 = vadd.f32 1.0, %v1842_v20 }
 0x3bd   :  { %v1844_v24 = vpop.eup %1843 }
 0x3be   :  { %1847 = vrcp.f32 %v434_v22  ;;  %v459_v26 = vadd.f32 1.0, %v1844_v24  ;;  %v1846_v28 = vpop.eup %1845 }
 0x3bf   :  { %1849 = vtanh.f32 %v429_v17 }
 0x3c0   :  { %1851 = vrcp.f32 %v459_v26 }
 0x3cb   :  { %v1848_v30 = vpop.eup %1847 }
 0x3cc   :  { %v1850_v31 = vpop.eup %1849  ;;  %v437_v18 = vsel %vm2197_vm5, %v1846_v28, %v1848_v30 }
 0x3cd   :  { %v1852_v33 = vpop.eup %1851  ;;  %440 = vrot.lane.b32.xlu0 %v437_v18, %s2052_s0  ;;  %v438_v42 = vmul.f32 %v437_v18, %v2214_v51 }
 0x3ce   :  { %v462_v34 = vsel %vm2197_vm5, %v1850_v31, %v1852_v33 }
 0x3cf   :  { %469 = vrot.lane.b32.xlu1 %v462_v34, %s2052_s0 }
 0x3d1   :  { %464 = vrot.lane.b32.xlu0 %v1682_v35, %s2053_s24 }
 0x43f   :  { %v441_v36 = vpop.permute.xlu0 %440 }
 0x440   :  { %v443_v37 = vmul.f32 %v441_v36, %v437_v18 }
 0x441   :  { %v470_v38 = vpop.permute.xlu1 %469 }
 0x442   :  { %v472_v39 = vmul.f32 %v470_v38, %v462_v34  ;;  %445 = vrot.lane.b32.xlu1 %v443_v37, %s2053_s24 }
 0x443   :  { %v465_v40 = vpop.permute.xlu0 %464 }
 0x444   :  { %474 = vrot.lane.b32.xlu0 %v472_v39, %s2053_s24  ;;  %v467_v44 = vmul.f32 %v465_v40, %v462_v34 }
 0x4b4   :  { %v446_v43 = vpop.permute.xlu1 %445 }
 0x4b5   :  { %v2321_v45 = vadd.f32 %v446_v43, %v438_v42 }
 0x4b6   :  { %v475_v46 = vpop.permute.xlu0 %474 }
 0x4b7   :  { %1853 = vtanh.f32 %v2321_v45  ;;  %v2324_v47 = vadd.f32 %v475_v46, %v467_v44 }
 0x4b9   :  { %1855 = vtanh.f32 %v2324_v47 }
 0x4c4   :  { %v1854_v48 = vpop.eup %1853 }
 0x4c5   :  { %451 = vrot.lane.b32.xlu1 %v1854_v48, %s2052_s0 }
 0x4c6   :  { %v1856_v49 = vpop.eup %1855 }
 0x4c7   :  { %480 = vrot.lane.b32.xlu0 %v1856_v49, %s2052_s0 }
 0x537   :  { %v452_v50 = vpop.permute.xlu1 %451 }
 0x538   :  { %v454_v62 = vmul.f32 %v452_v50, %v437_v18 }
 0x539   :  { %v481_v51 = vpop.permute.xlu0 %480 }
 0x53a   :  { %v2329_v1 = vmul.f32 %v481_v51, %v462_v34  ;;  %490 = vrot.lane.b32.xlu1 %v454_v62, %s2053_s24 }
 0x53c   :  { %493 = vrot.lane.b32.xlu0 %v2329_v1, %s2052_s0 }
 0x5ac   :  { %v491_v3 = vpop.permute.xlu1 %490 }
 0x5ae   :  { %v494_v4 = vpop.permute.xlu0 %493 }
 0x5af   :  { %v496_v6 = vsel %vm233_vm2, %v491_v3, %v494_v4 }
 0x5b0   :  { %1689 = vmatmul.mubr.msk.f32.vlgmr.msra.gmra.mxu1 %vm345_vm6, %v496_v6 }
 0x5b1   :  { %801 = vmatpush1.msra.mxu1 %v2219_v53  ;;  %848 = vmatprep.mubr.f32.mxu1 %v2050_v0 }
 0x5b2   :  { %802 = vmatprep.subr.mxu1 %v2221_v54 }
 0x5b3   :  { %803 = vmatpush1.msra.mxu1 %v2224_v55 }
 0x5b4   :  { %804 = vmatprep.subr.mxu1 %v2228_v56 }
 0x5b5   :  { %805 = vmatpush1.msra.mxu1 %v2232_v57 }
 0x5b6   :  { %806 = vmatprep.subr.mxu1 %v2236_v58 }
 0x5b7   :  { %807 = vmatpush1.msra.mxu1 %v2240_v59 }
 0x5b8   :  { %808 = vmatprep.subr.mxu1 %v2244_v60 }
 0x5b9   :  { %809 = vmatpush1.msra.mxu1 %v2132_v5 }
 0x5ba   :  { %810 = vmatprep.subr.mxu1 %v2250_v61 }
 0x5bb   :  { %811 = vmatpush1.msra.mxu1 %v2139_v7 }
 0x5bc   :  { %812 = vmatprep.subr.mxu1 %v2256_v63 }
 0x5bd   :  { %813 = vmatpush1.msra.mxu1 %v2150_v10 }
 0x5be   :  { %814 = vmatprep.subr.mxu1 %v2265_v2 }
 0x5bf   :  { %815 = vmatpush1.msra.mxu1 %v2155_v11 }
 0x5c0   :  { %1084 = vmatprep.subr.mxu1 %v2217_v52 }
 0x670   :  { %v566_v8 = vpop.f32.mrf.mxu1 }
 0x671   :  { %v573_v9 = vadd.f32 %v566_v8, %v2187_v23 }
 0x672   :  { %v568_v12 = vpop.f32.mrf.mxu1 }
 0x673   :  { %v1690_v14 = vmul.f32 -1.442695, %v573_v9  ;;  %v574_v15 = vadd.f32 %v2304_v13, %v568_v12 }
 0x675   :  { %1857 = vpow2.f32 %v1690_v14  ;;  %v1691_v16 = vmul.f32 -1.442695, %v574_v15 }
 0x677   :  { %1859 = vpow2.f32 %v1691_v16 }
 0x678   :  { %1861 = vtanh.f32 %v573_v9 }
 0x682   :  { %v1858_v17 = vpop.eup %1857 }
 0x683   :  { %v579_v19 = vadd.f32 1.0, %v1858_v17 }
 0x684   :  { %v1860_v20 = vpop.eup %1859 }
 0x685   :  { %1863 = vrcp.f32 %v579_v19  ;;  %v604_v22 = vadd.f32 1.0, %v1860_v20  ;;  %v1862_v24 = vpop.eup %1861 }
 0x686   :  { %1865 = vtanh.f32 %v574_v15 }
 0x687   :  { %1867 = vrcp.f32 %v604_v22 }
 0x692   :  { %v1864_v26 = vpop.eup %1863 }
 0x693   :  { %v1866_v28 = vpop.eup %1865  ;;  %v582_v23 = vsel %vm2197_vm5, %v1862_v24, %v1864_v26 }
 0x694   :  { %v1868_v30 = vpop.eup %1867  ;;  %585 = vrot.lane.b32.xlu1 %v582_v23, %s2052_s0  ;;  %v583_v36 = vmul.f32 %v582_v23, %v2321_v45 }
 0x695   :  { %v607_v31 = vsel %vm2197_vm5, %v1866_v28, %v1868_v30 }
 0x696   :  { %610 = vrot.lane.b32.xlu0 %v607_v31, %s2052_s0  ;;  %v608_v39 = vmul.f32 %v607_v31, %v2324_v47 }
 0x706   :  { %v586_v18 = vpop.permute.xlu1 %585 }
 0x707   :  { %v588_v33 = vmul.f32 %v586_v18, %v582_v23 }
 0x708   :  { %v611_v34 = vpop.permute.xlu0 %610 }
 0x709   :  { %v613_v35 = vmul.f32 %v611_v34, %v607_v31  ;;  %590 = vrot.lane.b32.xlu1 %v588_v33, %s2053_s24 }
 0x70b   :  { %615 = vrot.lane.b32.xlu0 %v613_v35, %s2053_s24 }
 0x77b   :  { %v591_v37 = vpop.permute.xlu1 %590 }
 0x77c   :  { %v2364_v38 = vadd.f32 %v591_v37, %v583_v36 }
 0x77d   :  { %v616_v40 = vpop.permute.xlu0 %615 }
 0x77e   :  { %1869 = vtanh.f32 %v2364_v38  ;;  %v2368_v42 = vadd.f32 %v616_v40, %v608_v39 }
 0x780   :  { %1871 = vtanh.f32 %v2368_v42 }
 0x78b   :  { %v1870_v43 = vpop.eup %1869 }
 0x78c   :  { %596 = vrot.lane.b32.xlu1 %v1870_v43, %s2052_s0 }
 0x78d   :  { %v1872_v44 = vpop.eup %1871 }
 0x78e   :  { %621 = vrot.lane.b32.xlu0 %v1872_v44, %s2052_s0 }
 0x7fe   :  { %v597_v46 = vpop.permute.xlu1 %596 }
 0x7ff   :  { %v599_v45 = vmul.f32 %v597_v46, %v582_v23 }
 0x800   :  { %v622_v48 = vpop.permute.xlu0 %621 }
 0x801   :  { %v2373_v49 = vmul.f32 %v622_v48, %v607_v31  ;;  %632 = vrot.lane.b32.xlu1 %v599_v45, %s2053_s24 }
 0x803   :  { %635 = vrot.lane.b32.xlu0 %v2373_v49, %s2052_s0 }
 0x873   :  { %v633_v47 = vpop.permute.xlu1 %632 }
 0x875   :  { %v636_v50 = vpop.permute.xlu0 %635 }
 0x876   :  { %v638_v62 = vsel %vm233_vm2, %v633_v47, %v636_v50 }
 0x877   :  { %1692 = vmatmul.mubr.msk.f32.vlgmr.msra.gmra.mxu0 %vm345_vm6, %v638_v62 }
 0x878   :  { %943 = vmatpush1.msra.mxu0 %v2219_v53  ;;  %990 = vmatprep.mubr.f32.mxu0 %v2050_v0 }
 0x879   :  { %944 = vmatprep.subr.mxu0 %v2221_v54 }
 0x87a   :  { %945 = vmatpush1.msra.mxu0 %v2224_v55 }
 0x87b   :  { %946 = vmatprep.subr.mxu0 %v2228_v56 }
 0x87c   :  { %947 = vmatpush1.msra.mxu0 %v2232_v57 }
 0x87d   :  { %948 = vmatprep.subr.mxu0 %v2236_v58 }
 0x87e   :  { %949 = vmatpush1.msra.mxu0 %v2240_v59 }
 0x87f   :  { %950 = vmatprep.subr.mxu0 %v2244_v60 }
 0x880   :  { %951 = vmatpush1.msra.mxu0 %v2132_v5 }
 0x881   :  { %952 = vmatprep.subr.mxu0 %v2250_v61 }
 0x882   :  { %953 = vmatpush1.msra.mxu0 %v2139_v7 }
 0x883   :  { %954 = vmatprep.subr.mxu0 %v2256_v63 }
 0x884   :  { %955 = vmatpush1.msra.mxu0 %v2150_v10 }
 0x885   :  { %956 = vmatprep.subr.mxu0 %v2265_v2 }
 0x886   :  { %957 = vmatpush1.msra.mxu0 %v2155_v11 }
 0x887   :  { %1226 = vmatprep.subr.mxu0 %v2217_v52 }
 0x937   :  { %v708_v51 = vpop.f32.mrf.mxu0 }
 0x938   :  { %v715_v3 = vadd.f32 %v708_v51, %v2185_v21 }
 0x939   :  { %v710_v4 = vpop.f32.mrf.mxu0 }
 0x93a   :  { %v1693_v6 = vmul.f32 -1.442695, %v715_v3  ;;  %v716_v8 = vadd.f32 %v2304_v13, %v710_v4 }
 0x93c   :  { %1873 = vpow2.f32 %v1693_v6  ;;  %v1694_v9 = vmul.f32 -1.442695, %v716_v8 }
 0x93e   :  { %1875 = vpow2.f32 %v1694_v9 }
 0x93f   :  { %1877 = vtanh.f32 %v715_v3 }
 0x949   :  { %v1874_v12 = vpop.eup %1873 }
 0x94a   :  { %v721_v14 = vadd.f32 1.0, %v1874_v12 }
 0x94b   :  { %v1876_v15 = vpop.eup %1875 }
 0x94c   :  { %1879 = vrcp.f32 %v721_v14  ;;  %v746_v16 = vadd.f32 1.0, %v1876_v15  ;;  %v1878_v17 = vpop.eup %1877 }
 0x94d   :  { %1881 = vtanh.f32 %v716_v8 }
 0x94e   :  { %1883 = vrcp.f32 %v746_v16 }
 0x959   :  { %v1880_v19 = vpop.eup %1879 }
 0x95a   :  { %v1882_v20 = vpop.eup %1881  ;;  %v724_v21 = vsel %vm2197_vm5, %v1878_v17, %v1880_v19 }
 0x95b   :  { %v1884_v22 = vpop.eup %1883  ;;  %727 = vrot.lane.b32.xlu1 %v724_v21, %s2052_s0  ;;  %v725_v31 = vmul.f32 %v724_v21, %v2364_v38 }
 0x95c   :  { %v749_v24 = vsel %vm2197_vm5, %v1882_v20, %v1884_v22 }
 0x95d   :  { %752 = vrot.lane.b32.xlu0 %v749_v24, %s2052_s0  ;;  %v750_v34 = vmul.f32 %v749_v24, %v2368_v42 }
 0x9cd   :  { %v728_v26 = vpop.permute.xlu1 %727 }
 0x9ce   :  { %v730_v28 = vmul.f32 %v728_v26, %v724_v21 }
 0x9cf   :  { %v753_v23 = vpop.permute.xlu0 %752 }
 0x9d0   :  { %v755_v30 = vmul.f32 %v753_v23, %v749_v24  ;;  %732 = vrot.lane.b32.xlu1 %v730_v28, %s2053_s24 }
 0x9d2   :  { %757 = vrot.lane.b32.xlu0 %v755_v30, %s2053_s24 }
 0xa42   :  { %v733_v18 = vpop.permute.xlu1 %732 }
 0xa43   :  { %v2408_v33 = vadd.f32 %v733_v18, %v725_v31 }
 0xa44   :  { %v758_v35 = vpop.permute.xlu0 %757 }
 0xa45   :  { %1885 = vtanh.f32 %v2408_v33  ;;  %v2412_v36 = vadd.f32 %v758_v35, %v750_v34 }
 0xa47   :  { %1887 = vtanh.f32 %v2412_v36 }
 0xa52   :  { %v1886_v37 = vpop.eup %1885 }
 0xa53   :  { %738 = vrot.lane.b32.xlu1 %v1886_v37, %s2052_s0 }
 0xa54   :  { %v1888_v39 = vpop.eup %1887 }
 0xa55   :  { %763 = vrot.lane.b32.xlu0 %v1888_v39, %s2052_s0 }
 0xac5   :  { %v739_v40 = vpop.permute.xlu1 %738 }
 0xac6   :  { %v741_v38 = vmul.f32 %v739_v40, %v724_v21 }
 0xac7   :  { %v764_v43 = vpop.permute.xlu0 %763 }
 0xac8   :  { %v2417_v44 = vmul.f32 %v764_v43, %v749_v24  ;;  %774 = vrot.lane.b32.xlu1 %v741_v38, %s2053_s24 }
 0xaca   :  { %777 = vrot.lane.b32.xlu0 %v2417_v44, %s2052_s0 }
 0xb3a   :  { %v775_v42 = vpop.permute.xlu1 %774 }
 0xb3c   :  { %v778_v46 = vpop.permute.xlu0 %777 }
 0xb3d   :  { %v780_v45 = vsel %vm233_vm2, %v775_v42, %v778_v46 }
 0xb3e   :  { %1695 = vmatmul.mubr.msk.f32.vlgmr.msra.gmra.mxu1 %vm345_vm6, %v780_v45 }
 0xb3f   :  { %1085 = vmatpush1.msra.mxu1 %v2219_v53  ;;  %1132 = vmatprep.mubr.f32.mxu1 %v2050_v0 }
 0xb40   :  { %1086 = vmatprep.subr.mxu1 %v2221_v54 }
 0xb41   :  { %1087 = vmatpush1.msra.mxu1 %v2224_v55 }
 0xb42   :  { %1088 = vmatprep.subr.mxu1 %v2228_v56 }
 0xb43   :  { %1089 = vmatpush1.msra.mxu1 %v2232_v57 }
 0xb44   :  { %1090 = vmatprep.subr.mxu1 %v2236_v58 }
 0xb45   :  { %1091 = vmatpush1.msra.mxu1 %v2240_v59 }
 0xb46   :  { %1092 = vmatprep.subr.mxu1 %v2244_v60 }
 0xb47   :  { %1093 = vmatpush1.msra.mxu1 %v2132_v5 }
 0xb48   :  { %1094 = vmatprep.subr.mxu1 %v2250_v61 }
 0xb49   :  { %1095 = vmatpush1.msra.mxu1 %v2139_v7 }
 0xb4a   :  { %1096 = vmatprep.subr.mxu1 %v2256_v63 }
 0xb4b   :  { %1097 = vmatpush1.msra.mxu1 %v2150_v10 }
 0xb4c   :  { %1098 = vmatprep.subr.mxu1 %v2265_v2 }
 0xb4d   :  { %1099 = vmatpush1.msra.mxu1 %v2155_v11 }
 0xb4e   :  { %1781 = vmatprep.subr.mxu1 %v2050_v0 }
 0xbfe   :  { %v850_v48 = vpop.f32.mrf.mxu1 }
 0xbff   :  { %v857_v47 = vadd.f32 %v850_v48, %v2191_v27 }
 0xc00   :  { %v852_v50 = vpop.f32.mrf.mxu1 }
 0xc01   :  { %v1696_v62 = vmul.f32 -1.442695, %v857_v47  ;;  %v858_v51 = vadd.f32 %v2304_v13, %v852_v50 }
 0xc03   :  { %1889 = vpow2.f32 %v1696_v62  ;;  %v1697_v3 = vmul.f32 -1.442695, %v858_v51 }
 0xc05   :  { %1891 = vpow2.f32 %v1697_v3 }
 0xc06   :  { %1893 = vtanh.f32 %v857_v47 }
 0xc10   :  { %v1890_v4 = vpop.eup %1889 }
 0xc11   :  { %v863_v6 = vadd.f32 1.0, %v1890_v4 }
 0xc12   :  { %v1892_v8 = vpop.eup %1891 }
 0xc13   :  { %1895 = vrcp.f32 %v863_v6  ;;  %v888_v9 = vadd.f32 1.0, %v1892_v8  ;;  %v1894_v12 = vpop.eup %1893 }
 0xc14   :  { %1897 = vtanh.f32 %v858_v51 }
 0xc15   :  { %1899 = vrcp.f32 %v888_v9 }
 0xc20   :  { %v1896_v14 = vpop.eup %1895 }
 0xc21   :  { %v1898_v15 = vpop.eup %1897  ;;  %v866_v27 = vsel %vm2197_vm5, %v1894_v12, %v1896_v14 }
 0xc22   :  { %v1900_v16 = vpop.eup %1899  ;;  %869 = vrot.lane.b32.xlu1 %v866_v27, %s2052_s0  ;;  %v867_v24 = vmul.f32 %v866_v27, %v2408_v33 }
 0xc23   :  { %v891_v17 = vsel %vm2197_vm5, %v1898_v15, %v1900_v16 }
 0xc24   :  { %894 = vrot.lane.b32.xlu0 %v891_v17, %s2052_s0  ;;  %v892_v23 = vmul.f32 %v891_v17, %v2412_v36 }
 0xc94   :  { %v870_v19 = vpop.permute.xlu1 %869 }
 0xc95   :  { %v872_v20 = vmul.f32 %v870_v19, %v866_v27 }
 0xc96   :  { %v895_v21 = vpop.permute.xlu0 %894 }
 0xc97   :  { %v897_v22 = vmul.f32 %v895_v21, %v891_v17  ;;  %874 = vrot.lane.b32.xlu1 %v872_v20, %s2053_s24 }
 0xc99   :  { %899 = vrot.lane.b32.xlu0 %v897_v22, %s2053_s24 }
 0xd09   :  { %v875_v26 = vpop.permute.xlu1 %874 }
 0xd0a   :  { %v2452_v28 = vadd.f32 %v875_v26, %v867_v24 }
 0xd0b   :  { %v900_v30 = vpop.permute.xlu0 %899 }
 0xd0c   :  { %1901 = vtanh.f32 %v2452_v28  ;;  %v2456_v31 = vadd.f32 %v900_v30, %v892_v23 }
 0xd0e   :  { %1903 = vtanh.f32 %v2456_v31 }
 0xd19   :  { %v1902_v18 = vpop.eup %1901 }
 0xd1a   :  { %880 = vrot.lane.b32.xlu1 %v1902_v18, %s2052_s0 }
 0xd1b   :  { %v1904_v34 = vpop.eup %1903 }
 0xd1c   :  { %905 = vrot.lane.b32.xlu0 %v1904_v34, %s2052_s0 }
 0xd8c   :  { %v881_v35 = vpop.permute.xlu1 %880 }
 0xd8d   :  { %v883_v33 = vmul.f32 %v881_v35, %v866_v27 }
 0xd8e   :  { %v906_v37 = vpop.permute.xlu0 %905 }
 0xd8f   :  { %v2461_v39 = vmul.f32 %v906_v37, %v891_v17  ;;  %916 = vrot.lane.b32.xlu1 %v883_v33, %s2053_s24 }
 0xd91   :  { %919 = vrot.lane.b32.xlu0 %v2461_v39, %s2052_s0 }
 0xe01   :  { %v917_v36 = vpop.permute.xlu1 %916 }
 0xe03   :  { %v920_v40 = vpop.permute.xlu0 %919 }
 0xe04   :  { %v922_v38 = vsel %vm233_vm2, %v917_v36, %v920_v40 }
 0xe05   :  { %1698 = vmatmul.mubr.msk.f32.vlgmr.msra.gmra.mxu0 %vm345_vm6, %v922_v38 }
 0xe06   :  { %1227 = vmatpush1.msra.mxu0 %v2219_v53  ;;  %1274 = vmatprep.mubr.f32.mxu0 %v2050_v0 }
 0xe07   :  { %1228 = vmatprep.subr.mxu0 %v2221_v54 }
 0xe08   :  { %1229 = vmatpush1.msra.mxu0 %v2224_v55 }
 0xe09   :  { %1230 = vmatprep.subr.mxu0 %v2228_v56 }
 0xe0a   :  { %1231 = vmatpush1.msra.mxu0 %v2232_v57 }
 0xe0b   :  { %1232 = vmatprep.subr.mxu0 %v2236_v58 }
 0xe0c   :  { %1233 = vmatpush1.msra.mxu0 %v2240_v59 }
 0xe0d   :  { %1234 = vmatprep.subr.mxu0 %v2244_v60 }
 0xe0e   :  { %1235 = vmatpush1.msra.mxu0 %v2132_v5 }
 0xe0f   :  { %1236 = vmatprep.subr.mxu0 %v2250_v61 }
 0xe10   :  { %1237 = vmatpush1.msra.mxu0 %v2139_v7 }
 0xe11   :  { %1238 = vmatprep.subr.mxu0 %v2256_v63 }
 0xe12   :  { %1239 = vmatpush1.msra.mxu0 %v2150_v10 }
 0xe13   :  { %1240 = vmatprep.subr.mxu0 %v2265_v2 }
 0xe14   :  { %1241 = vmatpush1.msra.mxu0 %v2155_v11 }
 0xec5   :  { %v992_v53 = vpop.f32.mrf.mxu0 }
 0xec6   :  { %v999_v55 = vadd.f32 %v992_v53, %v2189_v25 }
 0xec7   :  { %v994_v57 = vpop.f32.mrf.mxu0 }
 0xec8   :  { %v1699_v59 = vmul.f32 -1.442695, %v999_v55  ;;  %v1000_v43 = vadd.f32 %v2304_v13, %v994_v57 }
 0xeca   :  { %1905 = vpow2.f32 %v1699_v59  ;;  %v1700_v5 = vmul.f32 -1.442695, %v1000_v43 }
 0xecc   :  { %1907 = vpow2.f32 %v1700_v5 }
 0xecd   :  { %1909 = vtanh.f32 %v999_v55 }
 0xed7   :  { %v1906_v42 = vpop.eup %1905 }
 0xed8   :  { %v1005_v7 = vadd.f32 1.0, %v1906_v42 }
 0xed9   :  { %v1908_v46 = vpop.eup %1907 }
 0xeda   :  { %1911 = vrcp.f32 %v1005_v7  ;;  %v1030_v10 = vadd.f32 1.0, %v1908_v46  ;;  %v1910_v45 = vpop.eup %1909 }
 0xedb   :  { %1913 = vtanh.f32 %v1000_v43 }
 0xedc   :  { %1915 = vrcp.f32 %v1030_v10 }
 0xee7   :  { %v1912_v11 = vpop.eup %1911 }
 0xee8   :  { %v1914_v48 = vpop.eup %1913  ;;  %v1008_v25 = vsel %vm2197_vm5, %v1910_v45, %v1912_v11 }
 0xee9   :  { %v1916_v47 = vpop.eup %1915  ;;  %1011 = vrot.lane.b32.xlu1 %v1008_v25, %s2052_s0  ;;  %v1009_v6 = vmul.f32 %v1008_v25, %v2452_v28 }
 0xeea   :  { %v1033_v50 = vsel %vm2197_vm5, %v1914_v48, %v1916_v47 }
 0xeeb   :  { %1036 = vrot.lane.b32.xlu0 %v1033_v50, %s2052_s0  ;;  %v1034_v12 = vmul.f32 %v1033_v50, %v2456_v31 }
 0xf5b   :  { %v1012_v62 = vpop.permute.xlu1 %1011 }
 0xf5c   :  { %v1014_v51 = vmul.f32 %v1012_v62, %v1008_v25 }
 0xf5d   :  { %v1037_v3 = vpop.permute.xlu0 %1036 }
 0xf5e   :  { %v1039_v4 = vmul.f32 %v1037_v3, %v1033_v50  ;;  %1016 = vrot.lane.b32.xlu1 %v1014_v51, %s2053_s24 }
 0xf60   :  { %1041 = vrot.lane.b32.xlu0 %v1039_v4, %s2053_s24 }
 0xfd0   :  { %v1017_v8 = vpop.permute.xlu1 %1016 }
 0xfd1   :  { %v2495_v9 = vadd.f32 %v1017_v8, %v1009_v6 }
 0xfd2   :  { %v1042_v14 = vpop.permute.xlu0 %1041 }
 0xfd3   :  { %1917 = vtanh.f32 %v2495_v9  ;;  %v2499_v15 = vadd.f32 %v1042_v14, %v1034_v12 }
 0xfd5   :  { %1919 = vtanh.f32 %v2499_v15 }
 0xfe0   :  { %v1918_v27 = vpop.eup %1917 }
 0xfe1   :  { %1022 = vrot.lane.b32.xlu1 %v1918_v27, %s2052_s0 }
 0xfe2   :  { %v1920_v16 = vpop.eup %1919 }
 0xfe3   :  { %1047 = vrot.lane.b32.xlu0 %v1920_v16, %s2052_s0 }
0x1053   :  { %v1023_v17 = vpop.permute.xlu1 %1022 }
0x1054   :  { %v1025_v19 = vmul.f32 %v1023_v17, %v1008_v25 }
0x1055   :  { %v1048_v20 = vpop.permute.xlu0 %1047 }
0x1056   :  { %v2504_v21 = vmul.f32 %v1048_v20, %v1033_v50  ;;  %1058 = vrot.lane.b32.xlu1 %v1025_v19, %s2053_s24 }
0x1058   :  { %1061 = vrot.lane.b32.xlu0 %v2504_v21, %s2052_s0 }
0x10c8   :  { %v1059_v22 = vpop.permute.xlu1 %1058 }
0x10ca   :  { %v1062_v24 = vpop.permute.xlu0 %1061 }
0x10cb   :  { %v1064_v26 = vsel %vm233_vm2, %v1059_v22, %v1062_v24 }
0x10cc   :  { %1701 = vmatmul.mubr.msk.f32.vlgmr.msra.gmra.mxu1 %vm345_vm6, %v1064_v26 }
0x10cd   :  { %1782 = vmatpush3.msra.mxu1 %v2217_v52  ;;  %1797 = vmatprep.mubr.msk.f32.mxu1 %vm2051_vm1, %v2050_v0 }
0x10ce   :  { %1783 = vmatprep.subr.mxu1 %v2050_v0 }
0x10cf   :  { %1784 = vmatpush3.msra.mxu1 %v2221_v54 }
0x10d0   :  { %1785 = vmatprep.subr.mxu1 %v2050_v0 }
0x10d1   :  { %1786 = vmatpush3.msra.mxu1 %v2228_v56 }
0x10d2   :  { %1787 = vmatprep.subr.mxu1 %v2050_v0 }
0x10d3   :  { %1788 = vmatpush3.msra.mxu1 %v2236_v58 }
0x10d4   :  { %1789 = vmatprep.subr.mxu1 %v2050_v0 }
0x10d5   :  { %1790 = vmatpush3.msra.mxu1 %v2244_v60 }
0x10d6   :  { %1791 = vmatprep.subr.mxu1 %v2050_v0 }
0x10d7   :  { %1792 = vmatpush3.msra.mxu1 %v2250_v61 }
0x10d8   :  { %1793 = vmatprep.subr.mxu1 %v2050_v0 }
0x10d9   :  { %1794 = vmatpush3.msra.mxu1 %v2256_v63 }
0x10da   :  { %1795 = vmatprep.subr.mxu1 %v2050_v0 }
0x10db   :  { %1796 = vmatpush3.msra.mxu1 %v2265_v2 }
0x118c   :  { %v1134_v52 = vpop.f32.mrf.mxu1 }
0x118d   :  { %v1141_v54 = vadd.f32 %v1134_v52, %v2195_v32 }
0x118e   :  { %v1136_v56 = vpop.f32.mrf.mxu1 }
0x118f   :  { %v1702_v58 = vmul.f32 -1.442695, %v1141_v54  ;;  %v1142_v28 = vadd.f32 %v2304_v13, %v1136_v56 }
0x1191   :  { %1921 = vpow2.f32 %v1702_v58  ;;  %v1703_v60 = vmul.f32 -1.442695, %v1142_v28 }
0x1193   :  { %1923 = vpow2.f32 %v1703_v60 }
0x1194   :  { %1925 = vtanh.f32 %v1141_v54 }
0x119e   :  { %v1922_v23 = vpop.eup %1921 }
0x119f   :  { %v1147_v61 = vadd.f32 1.0, %v1922_v23 }
0x11a0   :  { %v1924_v30 = vpop.eup %1923 }
0x11a1   :  { %1927 = vrcp.f32 %v1147_v61  ;;  %v1172_v63 = vadd.f32 1.0, %v1924_v30  ;;  %v1926_v0 = vpop.eup %1925 }
0x11a2   :  { %1929 = vtanh.f32 %v1142_v28 }
0x11a3   :  { %1931 = vrcp.f32 %v1172_v63 }
0x11ae   :  { %v1928_v2 = vpop.eup %1927 }
0x11af   :  { %v1930_v31 = vpop.eup %1929  ;;  %v1150_v32 = vsel %vm2197_vm5, %v1926_v0, %v1928_v2 }
0x11b0   :  { %v1932_v18 = vpop.eup %1931  ;;  %1153 = vrot.lane.b32.xlu1 %v1150_v32, %s2052_s0  ;;  %v1151_v40 = vmul.f32 %v1150_v32, %v2495_v9 }
0x11b1   :  { %v1175_v34 = vsel %vm2197_vm5, %v1930_v31, %v1932_v18 }
0x11b2   :  { %1178 = vrot.lane.b32.xlu0 %v1175_v34, %s2052_s0  ;;  %v1176_v55 = vmul.f32 %v1175_v34, %v2499_v15 }
0x1222   :  { %v1154_v35 = vpop.permute.xlu1 %1153 }
0x1223   :  { %v1156_v33 = vmul.f32 %v1154_v35, %v1150_v32 }
0x1224   :  { %v1179_v37 = vpop.permute.xlu0 %1178 }
0x1225   :  { %v1181_v36 = vmul.f32 %v1179_v37, %v1175_v34  ;;  %1158 = vrot.lane.b32.xlu1 %v1156_v33, %s2053_s24 }
0x1227   :  { %1183 = vrot.lane.b32.xlu0 %v1181_v36, %s2053_s24 }
0x1297   :  { %v1159_v38 = vpop.permute.xlu1 %1158 }
0x1298   :  { %v1161_v53 = vadd.f32 %v1159_v38, %v1151_v40 }
0x1299   :  { %v1184_v57 = vpop.permute.xlu0 %1183 }
0x129a   :  { %1933 = vtanh.f32 %v1161_v53  ;;  %v1186_v59 = vadd.f32 %v1184_v57, %v1176_v55 }
0x129c   :  { %1935 = vtanh.f32 %v1186_v59 }
0x12a7   :  { %v1934_v43 = vpop.eup %1933 }
0x12a8   :  { %1164 = vrot.lane.b32.xlu1 %v1934_v43, %s2052_s0 }
0x12a9   :  { %v1936_v5 = vpop.eup %1935 }
0x12aa   :  { %1189 = vrot.lane.b32.xlu0 %v1936_v5, %s2052_s0 }
0x131a   :  { %v1165_v42 = vpop.permute.xlu1 %1164 }
0x131b   :  { %v1167_v7 = vmul.f32 %v1165_v42, %v1150_v32  ;;  %v1476_v42 = vld [vmem:[%s2646_s6 + $0x8] sm:$0xff] }
0x131c   :  { %v1190_v46 = vpop.permute.xlu0 %1189 }
0x131d   :  { %v2542_v10 = vmul.f32 %v1190_v46, %v1175_v34  ;;  %1200 = vrot.lane.b32.xlu1 %v1167_v7, %s2053_s24  ;;  %v1475_v7 = vld [vmem:[%s2646_s6] sm:$0xff] }
0x131f   :  { %1203 = vrot.lane.b32.xlu0 %v2542_v10, %s2052_s0 }
0x138f   :  { %v1201_v45 = vpop.permute.xlu1 %1200 }
0x1391   :  { %v1204_v11 = vpop.permute.xlu0 %1203 }
0x1392   :  { %v1206_v48 = vsel %vm233_vm2, %v1201_v45, %v1204_v11 }
0x1393   :  { %1704 = vmatmul.mubr.msk.f32.vlgmr.msra.gmra.mxu0 %vm345_vm6, %v1206_v48 }
0x1453   :  { %v1276_v25 = vpop.f32.mrf.mxu0 }
0x1454   :  { %v1283_v47 = vadd.f32 %v1276_v25, %v2193_v29 }
0x1455   :  { %v1278_v50 = vpop.f32.mrf.mxu0 }
0x1456   :  { %v1705_v62 = vmul.f32 -1.442695, %v1283_v47  ;;  %v1284_v51 = vadd.f32 %v2304_v13, %v1278_v50 }
0x1458   :  { %1937 = vpow2.f32 %v1705_v62  ;;  %v1706_v3 = vmul.f32 -1.442695, %v1284_v51 }
0x145a   :  { %1939 = vpow2.f32 %v1706_v3 }
0x145b   :  { %1941 = vtanh.f32 %v1283_v47 }
0x1465   :  { %v1938_v4 = vpop.eup %1937 }
0x1466   :  { %v1289_v6 = vadd.f32 1.0, %v1938_v4 }
0x1467   :  { %v1940_v8 = vpop.eup %1939 }
0x1468   :  { %1943 = vrcp.f32 %v1289_v6  ;;  %v1314_v9 = vadd.f32 1.0, %v1940_v8  ;;  %v1942_v12 = vpop.eup %1941 }
0x1469   :  { %1945 = vtanh.f32 %v1284_v51 }
0x146a   :  { %1947 = vrcp.f32 %v1314_v9 }
0x1475   :  { %v1944_v14 = vpop.eup %1943 }
0x1476   :  { %v1946_v15 = vpop.eup %1945  ;;  %v1292_v29 = vsel %vm2197_vm5, %v1942_v12, %v1944_v14 }
0x1477   :  { %v1948_v27 = vpop.eup %1947  ;;  %1295 = vrot.lane.b32.xlu1 %v1292_v29, %s2052_s0  ;;  %v1293_v24 = vmul.f32 %v1292_v29, %v1161_v53 }
0x1478   :  { %v1317_v16 = vsel %vm2197_vm5, %v1946_v15, %v1948_v27 }
0x1479   :  { %1320 = vrot.lane.b32.xlu0 %v1317_v16, %s2052_s0  ;;  %v1318_v54 = vmul.f32 %v1317_v16, %v1186_v59 }
0x14e9   :  { %v1296_v17 = vpop.permute.xlu1 %1295 }
0x14ea   :  { %v1298_v19 = vmul.f32 %v1296_v17, %v1292_v29 }
0x14eb   :  { %v1321_v20 = vpop.permute.xlu0 %1320 }
0x14ec   :  { %v1323_v22 = vmul.f32 %v1321_v20, %v1317_v16  ;;  %1300 = vrot.lane.b32.xlu1 %v1298_v19, %s2053_s24 }
0x14ee   :  { %1325 = vrot.lane.b32.xlu0 %v1323_v22, %s2053_s24 }
0x155e   :  { %v1301_v26 = vpop.permute.xlu1 %1300 }
0x155f   :  { %v1303_v52 = vadd.f32 %v1301_v26, %v1293_v24 }
0x1560   :  { %v1326_v56 = vpop.permute.xlu0 %1325 }
0x1561   :  { %1949 = vtanh.f32 %v1303_v52  ;;  %v1328_v58 = vadd.f32 %v1326_v56, %v1318_v54 }
0x1563   :  { %1951 = vtanh.f32 %v1328_v58 }
0x156e   :  { %v1950_v28 = vpop.eup %1949 }
0x156f   :  { %1306 = vrot.lane.b32.xlu1 %v1950_v28, %s2052_s0 }
0x1570   :  { %v1952_v60 = vpop.eup %1951 }
0x1571   :  { %1331 = vrot.lane.b32.xlu0 %v1952_v60, %s2052_s0 }
0x15e1   :  { %v1307_v23 = vpop.permute.xlu1 %1306 }
0x15e2   :  { %v1309_v61 = vmul.f32 %v1307_v23, %v1292_v29 }
0x15e3   :  { %v1332_v30 = vpop.permute.xlu0 %1331 }
0x15e4   :  { %v1334_v63 = vmul.f32 %v1332_v30, %v1317_v16  ;;  %1342 = vrot.lane.b32.xlu1 %v1309_v61, %s2053_s24 }
0x15e6   :  { %1345 = vrot.lane.b32.xlu0 %v1334_v63, %s2052_s0 }
0x1656   :  { %v1343_v0 = vpop.permute.xlu1 %1342 }
0x1657   :  { %1453 = vst.msk [vmem:[#allocation8] sm:$0xff] %vm233_vm2, %v1343_v0 }
0x1658   :  { %v1346_v2 = vpop.permute.xlu0 %1345 }
0x1659   :  { %v1348_v31 = vsel %vm233_vm2, %v1343_v0, %v1346_v2 }
0x165a   :  { %1798 = vmatmul.mubr.msk.f32.vlgmr.msra.gmra.mxu1 %vm345_vm6, %v1348_v31 }
0x171a   :  { %v1418_v32 = vpop.f32.mrf.mxu1 }
0x171b   :  { %v1419_v18 = vadd.f32 %v2304_v13, %v1418_v32 }
0x171c   :  { %v1799_v34 = vpop.f32.mrf.mxu1 }
0x171d   :  { %v1708_v35 = vmul.f32 -1.442695, %v1419_v18 }
0x171f   :  { %1953 = vpow2.f32 %v1708_v35 }
0x1720   :  { %1955 = vtanh.f32 %v1419_v18 }
0x172c   :  { %v1954_v33 = vpop.eup %1953 }
0x172d   :  { %v1426_v37 = vadd.f32 1.0, %v1954_v33  ;;  %v1956_v36 = vpop.eup %1955 }
0x172f   :  { %1957 = vrcp.f32 %v1426_v37 }
0x173c   :  { %v1958_v40 = vpop.eup %1957 }
0x173d   :  { %v1429_v38 = vsel %vm2197_vm5, %v1956_v36, %v1958_v40 }
0x173e   :  { %1432 = vrot.lane.b32.xlu1 %v1429_v38, %s2052_s0  ;;  %v1430_v41 = vmul.f32 %v1429_v38, %v1328_v58 }
0x17b0   :  { %v1433_v53 = vpop.permute.xlu1 %1432 }
0x17b1   :  { %v1435_v55 = vmul.f32 %v1433_v53, %v1429_v38 }
0x17b3   :  { %1437 = vrot.lane.b32.xlu0 %v1435_v55, %s2053_s24 }
0x17b7   :  { %485 = vrot.lane.b32.xlu0 %v2329_v1, %s2053_s24  ;;  %v1478_v1 = vld [vmem:[%s2646_s6 + $0x18] sm:$0xff] }
0x17b8   :  { %1800 = vmatprep.subr.mxu0 %v1478_v1 }
0x17b9   :  { %1801 = vmatpush3.msra.mxu0 %v1478_v1 }
0x17bb   :  { %768 = vrot.lane.b32.xlu0 %v2417_v44, %s2053_s24  ;;  %v1477_v44 = vld [vmem:[%s2646_s6 + $0x10] sm:$0xff]  ;;  %s2055_s6 = smov [#allocation8]  }
0x17bc   :  { %1802 = vmatprep.subr.mxu0 %v1477_v44  ;;  %s1640_s15 = sshll.u32 %s2055_s6, 4  ;;  %s1641_s15 = int_to_ptr.vmem [resolvable:$true] %s1640_s15 }
0x17bd   :  { %1803 = vmatpush3.msra.mxu0 %v1477_v44  ;;  %s1981_s16 = scalar_lea.vmem %s1641_s15, 256  ;;  %p1986_p6 = scmp.lt.s32.totalorder %s1641_s15, %s1641_s15 }
0x17be   :  { %1804 = vmatprep.subr.mxu0 %v1476_v42  ;;  %p1982_p5 = scmp.ne.s32.totalorder %s1641_s15, %s1981_s16  ;;  %p1987_p7 = scmp.lt.s32.totalorder %s1981_s16, %s1981_s16 }
0x17bf   :  { %1052 = vrot.lane.b32.xlu0 %v2504_v21, %s2053_s24  ;;  %1805 = vmatpush3.msra.mxu0 %v1476_v42 }
0x17c0   :  { %1806 = vmatprep.subr.mxu0 %v1475_v7  ;;  %p1988_p8 = por %p1987_p7, %p1986_p6 }
0x17c1   :  { %1807 = vmatpush3.msra.mxu0 %v1475_v7 }
0x17c2   :  { %p1989_p9 = pnand %p1988_p8, %p1982_p5 }
0x17c3   :  { %1336 = vrot.lane.b32.xlu0 %v1334_v63, %s2053_s24 }
0x17c7   :  { %1455 = vrot.lane.b32.xlu0 %v1303_v52, %s2054_s2 }
0x1825   :  { %v1438_v13 = vpop.permute.xlu0 %1437 }
0x1826   :  { %v1440_v57 = vadd.f32 %v1438_v13, %v1430_v41 }
0x1828   :  { %1959 = vtanh.f32 %v1440_v57 }
0x1829   :  { %v486_v59 = vpop.permute.xlu0 %485 }
0x182a   :  { %488 = vst.msk [vmem:[#allocation2] sm:$0xff] %vm233_vm2, %v486_v59 }
0x182d   :  { %v769_v43 = vpop.permute.xlu0 %768 }
0x182e   :  { %772 = vst.msk [vmem:[#allocation2 + $0x10] sm:$0xff] %vm233_vm2, %v769_v43 }
0x1831   :  { %v1053_v21 = vpop.permute.xlu0 %1052  ;;  %v1467_v5 = vld [vmem:[#allocation2] sm:$0xff] }
0x1832   :  { %1056 = vst.msk [vmem:[#allocation2 + $0x20] sm:$0xff] %vm233_vm2, %v1053_v21  ;;  %1808 = vmatprep.mubr.msk.f32.mxu0 %vm233_vm2, %v1467_v5 }
0x1835   :  { %v1960_v46 = vpop.eup %1959  ;;  %v1337_v45 = vpop.permute.xlu0 %1336 }
0x1836   :  { %1340 = vst.msk [vmem:[#allocation2 + $0x30] sm:$0xff] %vm233_vm2, %v1337_v45  ;;  %1443 = vrot.lane.b32.xlu1 %v1960_v46, %s2052_s0 }
0x1839   :  { %v1456_v11 = vpop.permute.xlu0 %1455  ;;  %v1471_v51 = vld [vmem:[#allocation2 + $0x20] sm:$0xff] }
0x183a   :  { %1458 = vst.msk [vmem:[#allocation10] sm:$0xff] %vm233_vm2, %v1456_v11  ;;  %626 = vrot.lane.b32.xlu1 %v2373_v49, %s2053_s24 }
0x183d   :  { %v1473_v4 = vld [vmem:[#allocation2 + $0x30] sm:$0xff] }
0x183e   :  { %910 = vrot.lane.b32.xlu1 %v2461_v39, %s2053_s24  ;;  %v1469_v39 = vld [vmem:[#allocation2 + $0x10] sm:$0xff] }
0x1842   :  { %1194 = vrot.lane.b32.xlu1 %v2542_v10, %s2053_s24 }
0x18a8   :  { %v1444_v48 = vpop.permute.xlu1 %1443 }
0x18a9   :  { %v1446_v25 = vmul.f32 %v1444_v48, %v1429_v38 }
0x18ab   :  { %1448 = vrot.lane.b32.xlu1 %v1446_v25, %s2053_s24 }
0x18ac   :  { %v627_v47 = vpop.permute.xlu1 %626 }
0x18ad   :  { %630 = vst.msk [vmem:[#allocation2 + $0x8] sm:$0xff] %vm233_vm2, %v627_v47 }
0x18af   :  { %1462 = vrot.lane.b32.xlu1 %v1440_v57, %s2054_s2 }
0x18b0   :  { %v911_v50 = vpop.permute.xlu1 %910 }
0x18b1   :  { %914 = vst.msk [vmem:[#allocation2 + $0x18] sm:$0xff] %vm233_vm2, %v911_v50 }
0x18b4   :  { %v1195_v62 = vpop.permute.xlu1 %1194  ;;  %v1468_v49 = vld [vmem:[#allocation2 + $0x8] sm:$0xff] }
0x18b5   :  { %1198 = vst.msk [vmem:[#allocation2 + $0x28] sm:$0xff] %vm233_vm2, %v1195_v62  ;;  %1809 = vmatmul.mubr.msk.f32.vlgmr.msra.gmra.mxu0 %vm233_vm2, %v1468_v49 }
0x18b6   :  { %1811 = vmatprep.mubr.msk.f32.mxu0 %vm233_vm2, %v1469_v39 }
0x18b8   :  { %v1470_v10 = vld [vmem:[#allocation2 + $0x18] sm:$0xff] }
0x18b9   :  { %1812 = vmatmul.mubr.msk.f32.gmra.mxu0 %vm233_vm2, %v1470_v10 }
0x18ba   :  { %1814 = vmatprep.mubr.msk.f32.mxu0 %vm233_vm2, %v1471_v51 }
0x18bc   :  { %v1472_v3 = vld [vmem:[#allocation2 + $0x28] sm:$0xff] }
0x18bd   :  { %1815 = vmatmul.mubr.msk.f32.gmra.mxu0 %vm233_vm2, %v1472_v3 }
0x18be   :  { %1817 = vmatprep.mubr.msk.f32.mxu0 %vm233_vm2, %v1473_v4 }
0x191d   :  { %v1449_v6 = vpop.permute.xlu1 %1448 }
0x191e   :  { %1452 = vst.msk [vmem:[#allocation2 + $0x38] sm:$0xff] %vm233_vm2, %v1449_v6  ;;  %1460 = vst.msk [vmem:[#allocation8 + $0x8] sm:$0xff] %vm233_vm2, %v1449_v6 }
0x1921   :  { %v1463_v8 = vpop.permute.xlu1 %1462 }
0x1922   :  { %1466 = vst.msk [vmem:[#allocation10 + $0x8] sm:$0xff] %vm233_vm2, %v1463_v8 }
0x1925   :  { %v1474_v9 = vld [vmem:[#allocation2 + $0x38] sm:$0xff] }
0x1926   :  { %1818 = vmatmul.mubr.msk.f32.gmra.mxu0 %vm233_vm2, %v1474_v9 }
0x1927   :  { %1992 = shalt.err (!%p1989_p9)
}
0x1928   :  { %s2056_s17 = smov 128   ;;  %s2057_s18 = smov 8  }
0x1929   :  { %1646 = dma.vmem_to_hbm [thread:$0]  %s1641_s15, 256, %s2649_s9, [#allocation9], %s2056_s17, %s2056_s17, %s2057_s18  }
0x192a   :  { %s2058_s21 = smov [#allocation10]  }
0x192b   :  { %s1652_s0 = sshll.u32 %s2058_s21, 4  ;;  %s1653_s0 = int_to_ptr.vmem [resolvable:$true] %s1652_s0 }
0x192c   :  { %s2001_s22 = scalar_lea.vmem %s1653_s0, 256  ;;  %p2006_p11 = scmp.lt.s32.totalorder %s1653_s0, %s1653_s0 }
0x192d   :  { %p2002_p10 = scmp.ne.s32.totalorder %s1653_s0, %s2001_s22  ;;  %p2007_p12 = scmp.lt.s32.totalorder %s2001_s22, %s2001_s22 }
0x192f   :  { %p2008_p13 = por %p2007_p12, %p2006_p11 }
0x1931   :  { %p2009_p0 = pnand %p2008_p13, %p2002_p10 }
0x1933   :  { %2012 = shalt.err (!%p2009_p0)
}
0x1934   :  { %1658 = dma.vmem_to_hbm [thread:$0]  %s1653_s0, 256, %s2650_s10, [#allocation9], %s2056_s17, %s2056_s17, %s2057_s18  }
0x1935   :  { %v1709_v12 = vld [vmem:[%s2647_s7] ss:$0 sm:$0xff]  ;;  %s2059_s7 = smov [#allocation7]  }
0x1936   :  { %s1628_s9 = sshll.u32 %s2059_s7, 4  ;;  %s1629_s9 = int_to_ptr.vmem [resolvable:$true] %s1628_s9 }
0x1937   :  { %s2021_s10 = scalar_lea.vmem %s1629_s9, 1024  ;;  %p2026_p2 = scmp.lt.s32.totalorder %s1629_s9, %s1629_s9 }
0x1938   :  { %p2022_p1 = scmp.ne.s32.totalorder %s1629_s9, %s2021_s10  ;;  %p2027_p3 = scmp.lt.s32.totalorder %s2021_s10, %s2021_s10 }
0x193a   :  { %p2028_p4 = por %p2027_p3, %p2026_p2 }
0x193c   :  { %p2029_p5 = pnand %p2028_p4, %p2022_p1 }
0x1975   :  { %v1810_v14 = vpop.f32.mrf.mxu0 }
0x1976   :  { %v1582_v15 = vadd.f32 %v1810_v14, %v1709_v12 }
0x1977   :  { %v1576_v29 = vpop.f32.mrf.mxu0 }
0x1978   :  { %1616 = vst [vmem:[#allocation7 + $0x8] sm:$0xff] %v1582_v15  ;;  %v1577_v27 = vadd.f32 %v1709_v12, %v1576_v29 }
0x1979   :  { %v1813_v16 = vpop.f32.mrf.mxu0 }
0x197a   :  { %1615 = vst [vmem:[#allocation7] sm:$0xff] %v1577_v27  ;;  %v1592_v17 = vadd.f32 %v1813_v16, %v1709_v12 }
0x197b   :  { %v1586_v19 = vpop.f32.mrf.mxu0 }
0x197c   :  { %1618 = vst [vmem:[#allocation7 + $0x18] sm:$0xff] %v1592_v17  ;;  %v1587_v20 = vadd.f32 %v1709_v12, %v1586_v19 }
0x197d   :  { %v1816_v22 = vpop.f32.mrf.mxu0 }
0x197e   :  { %1617 = vst [vmem:[#allocation7 + $0x10] sm:$0xff] %v1587_v20  ;;  %v1602_v24 = vadd.f32 %v1816_v22, %v1709_v12 }
0x197f   :  { %v1596_v26 = vpop.f32.mrf.mxu0 }
0x1980   :  { %1620 = vst [vmem:[#allocation7 + $0x28] sm:$0xff] %v1602_v24  ;;  %v1597_v52 = vadd.f32 %v1709_v12, %v1596_v26 }
0x1982   :  { %1619 = vst [vmem:[#allocation7 + $0x20] sm:$0xff] %v1597_v52 }
0x19e6   :  { %v1819_v54 = vpop.f32.mrf.mxu0 }
0x19e7   :  { %v1612_v56 = vadd.f32 %v1819_v54, %v1709_v12 }
0x19e8   :  { %v1606_v58 = vpop.f32.mrf.mxu0 }
0x19e9   :  { %1622 = vst [vmem:[#allocation7 + $0x38] sm:$0xff] %v1612_v56  ;;  %v1607_v28 = vadd.f32 %v1709_v12, %v1606_v58 }
0x19eb   :  { %1621 = vst [vmem:[#allocation7 + $0x30] sm:$0xff] %v1607_v28 }
0x19ec   :  { %2032 = shalt.err (!%p2029_p5)
}
0x19ed   :  { %1634 = dma.vmem_to_hbm [thread:$0]  %s1629_s9, 1024, %s2648_s8, [#allocation6], %s2056_s17, %s2056_s17, %s2057_s18  }
0x19ee   :  { %2043 = dma.done.wait [#allocation6], 1024  }
0x19ef   :  { %2044 = vsyncadd [#allocation6], 4294966272 }
0x19f0   :  { %2045 = dma.done.wait [#allocation9], 512  }
0x19f1   :  { %2046 = vsyncadd [#allocation9], 4294966784 }
0x19f2   :  { %1668 = vsyncpa [#allocation5], 1 }
0x19f3   :  { %1669 = vsyncpa [#allocation6], 1 }
0x19f4   :  { %1670 = vsyncpa [#allocation9], 1 }

</bundles_post_ra>
